<compile_context>
chip_gen: v7x
topology: tpu7x:2x2x1
jax: 0.10.0
libtpu: 0.0.40
codegen_flags: <defaults>
</compile_context>

<pallas_src>
import functools

import jax
import jax.numpy as jnp
from jax.experimental import pallas as pl
from jax.experimental.pallas import tpu as pltpu


def _round_up(n, m):
    return ((n + m - 1) // m) * m


def _mlp_kernel(x_ref,
                w1_ref, b1_ref,
                w2_ref, b2_ref,
                w3_ref, b3_ref,
                w4_ref, b4_ref,
                w5_ref, b5_ref,
                o_ref):
    # Compute dtype (bf16 or f32) comes from the input tile; accumulation is
    # always f32 via preferred_element_type.  Biases are kept in f32.
    cdt = x_ref.dtype

    h = x_ref[...]
    h = jnp.dot(h, w1_ref[...], preferred_element_type=jnp.float32) + b1_ref[...]
    h = jnp.maximum(h, 0.0).astype(cdt)

    h = jnp.dot(h, w2_ref[...], preferred_element_type=jnp.float32) + b2_ref[...]
    h = jnp.maximum(h, 0.0).astype(cdt)

    h = jnp.dot(h, w3_ref[...], preferred_element_type=jnp.float32) + b3_ref[...]
    h = jnp.maximum(h, 0.0).astype(cdt)

    h = jnp.dot(h, w4_ref[...], preferred_element_type=jnp.float32) + b4_ref[...]
    h = jnp.maximum(h, 0.0).astype(cdt)

    h = jnp.dot(h, w5_ref[...], preferred_element_type=jnp.float32) + b5_ref[...]

    o_ref[...] = h.astype(o_ref.dtype)


@functools.partial(jax.jit, static_argnames=("block_b", "compute_dtype"))
def baseline_nn_forward(x, params, block_b=256, compute_dtype="bfloat16"):
    """BaselineNn forward pass with a single fused Pallas TPU kernel.

    x: (B, n_in) or (n_in,) float32
    params: list of 5 (W, b) pairs, W shaped (in, out), b shaped (1, out).
    """
    cdt = jnp.dtype(compute_dtype)

    if x.ndim == 1:                      # mirror the PyTorch reshape(1, -1)
        x = x.reshape(1, -1)
    B, n_in = x.shape
    n_out = params[-1][0].shape[1]

    # Layer widths and their lane-dense (multiple-of-128) padded versions.
    dims = [n_in] + [w.shape[1] for (w, _) in params]
    pdims = [_round_up(d, 128) for d in dims]

    # Zero-pad weights/biases up to the padded widths (math stays exact) and
    # cast weights to the compute dtype.  Biases stay f32 (added post-matmul).
    padded_params = []
    for li, (w, b) in enumerate(params):
        d_in, d_out = dims[li], dims[li + 1]
        pdi, pdo = pdims[li], pdims[li + 1]
        w_p = jnp.pad(w, ((0, pdi - d_in), (0, pdo - d_out))).astype(cdt)
        b_p = jnp.pad(b.reshape(1, -1), ((0, 0), (0, pdo - d_out)))
        b_p = b_p.astype(jnp.float32)
        padded_params.append((w_p, b_p))

    # Batch tiling: big tiles for MXU occupancy; pad the batch so the grid has
    # at least 2 program instances (v7x has 2 TensorCores to feed).
    tb = max(8, block_b)
    B_pad = max(_round_up(B, tb), 2 * tb)
    x_p = jnp.pad(x, ((0, B_pad - B), (0, pdims[0] - n_in))).astype(cdt)

    grid = (B_pad // tb,)

    # BlockSpecs: x/out tiled over batch; weights/biases whole-array resident
    # in VMEM (constant index_map -> no per-step re-DMA).
    in_specs = [pl.BlockSpec((tb, pdims[0]), lambda i: (i, 0))]
    flat_args = [x_p]
    for (w_p, b_p) in padded_params:
        in_specs.append(pl.BlockSpec(w_p.shape, lambda i: (0, 0)))
        in_specs.append(pl.BlockSpec(b_p.shape, lambda i: (0, 0)))
        flat_args.extend([w_p, b_p])
    out_spec = pl.BlockSpec((tb, pdims[-1]), lambda i: (i, 0))

    # VMEM budget (weights double-buffered by default + io tiles + f32
    # intermediates), with headroom; capped at 64 MiB (<= physical on v7x).
    param_bytes = sum(w.size * w.dtype.itemsize + b.size * b.dtype.itemsize
                      for (w, b) in padded_params)
    io_bytes = tb * pdims[0] * cdt.itemsize + tb * pdims[-1] * 4
    act_bytes = tb * max(pdims) * 4
    vmem_est = 2 * param_bytes + 2 * io_bytes + 4 * act_bytes
    vmem_limit = int(min(max(2 * vmem_est, 32 * 1024 * 1024),
                         64 * 1024 * 1024))

    flops = 2 * B_pad * sum(pdims[i] * pdims[i + 1] for i in range(5))
    bytes_accessed = (x_p.size * x_p.dtype.itemsize
                      + B_pad * pdims[-1] * 4
                      + param_bytes)

    out = pl.pallas_call(
        _mlp_kernel,
        out_shape=jax.ShapeDtypeStruct((B_pad, pdims[-1]), jnp.float32),
        grid_spec=pltpu.PrefetchScalarGridSpec(
            num_scalar_prefetch=0,
            grid=grid,
            in_specs=in_specs,
            out_specs=out_spec,
        ),
        compiler_params=pltpu.CompilerParams(
            dimension_semantics=("parallel",),
            vmem_limit_bytes=vmem_limit,
        ),
        cost_estimate=pl.CostEstimate(
            flops=flops, transcendentals=0, bytes_accessed=bytes_accessed),
    )(*flat_args)

    return out[:B, :n_out]


def init_params(key, n_in, n_out):
    """Deterministic init matching BaselineNn layer shapes.

    Weights stored as (in, out) — i.e. transpose of torch's (out, in).
    """
    dims = [n_in, 2 * n_in, 4 * n_in, 4 * n_in, 2 * n_in, n_out]
    params = []
    for li in range(5):
        d_in, d_out = dims[li], dims[li + 1]
        key, kw, kb = jax.random.split(key, 3)
        bound = 1.0 / jnp.sqrt(d_in)   # torch.nn.Linear default-ish init
        w = jax.random.uniform(kw, (d_in, d_out), jnp.float32, -bound, bound)
        b = jax.random.uniform(kb, (1, d_out), jnp.float32, -bound, bound)
        params.append((w, b))
    return params


def reference_forward(x, params):
    h = x
    for i, (w, b) in enumerate(params):
        h = h @ w + b
        if i < len(params) - 1:
            h = jnp.maximum(h, 0.0)
    return h


if __name__ == "__main__":
    key = jax.random.PRNGKey(0)
    n_in, n_out = 32, 16
    batch = 8

    kx, kp = jax.random.split(key)
    x = jax.random.normal(kx, (batch, n_in), jnp.float32)
    params = init_params(kp, n_in, n_out)

    ref = reference_forward(x, params)

    # Exact f32 path: validates padding / tiling correctness bit-for-bit-ish.
    out_f32 = jax.block_until_ready(
        baseline_nn_forward(x, params, compute_dtype="float32"))
    assert out_f32.shape == (batch, n_out), out_f32.shape
    assert jnp.allclose(out_f32, ref, atol=1e-5, rtol=1e-5), (
        float(jnp.max(jnp.abs(out_f32 - ref))))

    # Default bf16-compute path (f32 accumulation): looser tolerance.
    out_bf16 = jax.block_until_ready(baseline_nn_forward(x, params))
    assert out_bf16.shape == (batch, n_out), out_bf16.shape
    assert jnp.allclose(out_bf16, ref, atol=5e-2, rtol=5e-2), (
        float(jnp.max(jnp.abs(out_bf16 - ref))))

    print("KERNEL_OK")
</pallas_src>

<mosaic_0001>
module attributes {stable_mosaic.version = 11 : i64} {
  func.func @_mlp_kernel(%arg0: i32, %arg1: memref<256x128xf32, #tpu.memory_space<vmem>>, %arg2: memref<128x128xf32, #tpu.memory_space<vmem>>, %arg3: memref<1x128xf32, #tpu.memory_space<vmem>>, %arg4: memref<128x128xf32, #tpu.memory_space<vmem>>, %arg5: memref<1x128xf32, #tpu.memory_space<vmem>>, %arg6: memref<128x128xf32, #tpu.memory_space<vmem>>, %arg7: memref<1x128xf32, #tpu.memory_space<vmem>>, %arg8: memref<128x128xf32, #tpu.memory_space<vmem>>, %arg9: memref<1x128xf32, #tpu.memory_space<vmem>>, %arg10: memref<128x128xf32, #tpu.memory_space<vmem>>, %arg11: memref<1x128xf32, #tpu.memory_space<vmem>>, %arg12: memref<256x128xf32, #tpu.memory_space<vmem>>) attributes {dimension_semantics = [#tpu.dimension_semantics<parallel>], iteration_bounds = array<i64: 2>, scalar_prefetch = 0 : i64, scratch_operands = 0 : i64, tpu.core_type = #tpu.core_type<tc>, window_params = [{transform_indices = @transform_0, window_bounds = array<i64: 256, 128>}, {pipeline_mode = #tpu.pipeline_mode<synchronous>, transform_indices = @transform_1, window_bounds = array<i64: 128, 128>}, {pipeline_mode = #tpu.pipeline_mode<synchronous>, transform_indices = @transform_2, window_bounds = array<i64: 1, 128>}, {pipeline_mode = #tpu.pipeline_mode<synchronous>, transform_indices = @transform_3, window_bounds = array<i64: 128, 128>}, {pipeline_mode = #tpu.pipeline_mode<synchronous>, transform_indices = @transform_4, window_bounds = array<i64: 1, 128>}, {pipeline_mode = #tpu.pipeline_mode<synchronous>, transform_indices = @transform_5, window_bounds = array<i64: 128, 128>}, {pipeline_mode = #tpu.pipeline_mode<synchronous>, transform_indices = @transform_6, window_bounds = array<i64: 1, 128>}, {pipeline_mode = #tpu.pipeline_mode<synchronous>, transform_indices = @transform_7, window_bounds = array<i64: 128, 128>}, {pipeline_mode = #tpu.pipeline_mode<synchronous>, transform_indices = @transform_8, window_bounds = array<i64: 1, 128>}, {pipeline_mode = #tpu.pipeline_mode<synchronous>, transform_indices = @transform_9, window_bounds = array<i64: 128, 128>}, {pipeline_mode = #tpu.pipeline_mode<synchronous>, transform_indices = @transform_10, window_bounds = array<i64: 1, 128>}, {transform_indices = @transform_11, window_bounds = array<i64: 256, 128>}]} {
    %c0 = arith.constant 0 : index
    %c0_0 = arith.constant 0 : index
    %0 = vector.load %arg1[%c0, %c0_0] : memref<256x128xf32, #tpu.memory_space<vmem>>, vector<256x128xf32>
    %c0_1 = arith.constant 0 : index
    %c0_2 = arith.constant 0 : index
    %1 = vector.load %arg2[%c0_1, %c0_2] : memref<128x128xf32, #tpu.memory_space<vmem>>, vector<128x128xf32>
    %cst = arith.constant dense<0.000000e+00> : vector<256x128xf32>
    %2 = tpu.matmul %0, %1, %cst {dimension_numbers = #tpu.dot_dimension_numbers<[1], [0], [0], [1], [0, 0, 1, 1], [], []>} : vector<256x128xf32>, vector<128x128xf32>, vector<256x128xf32> -> vector<256x128xf32>
    %c0_3 = arith.constant 0 : index
    %c0_4 = arith.constant 0 : index
    %3 = vector.load %arg3[%c0_3, %c0_4] : memref<1x128xf32, #tpu.memory_space<vmem>>, vector<1x128xf32>
    %4 = vector.broadcast %3 : vector<1x128xf32> to vector<256x128xf32>
    %5 = arith.addf %2, %4 : vector<256x128xf32>
    %cst_5 = arith.constant 0.000000e+00 : f32
    %6 = vector.broadcast %cst_5 : f32 to vector<256x128xf32>
    %7 = arith.maximumf %5, %6 : vector<256x128xf32>
    %c0_6 = arith.constant 0 : index
    %c0_7 = arith.constant 0 : index
    %8 = vector.load %arg4[%c0_6, %c0_7] : memref<128x128xf32, #tpu.memory_space<vmem>>, vector<128x128xf32>
    %cst_8 = arith.constant dense<0.000000e+00> : vector<256x128xf32>
    %9 = tpu.matmul %7, %8, %cst_8 {dimension_numbers = #tpu.dot_dimension_numbers<[1], [0], [0], [1], [0, 0, 1, 1], [], []>} : vector<256x128xf32>, vector<128x128xf32>, vector<256x128xf32> -> vector<256x128xf32>
    %c0_9 = arith.constant 0 : index
    %c0_10 = arith.constant 0 : index
    %10 = vector.load %arg5[%c0_9, %c0_10] : memref<1x128xf32, #tpu.memory_space<vmem>>, vector<1x128xf32>
    %11 = vector.broadcast %10 : vector<1x128xf32> to vector<256x128xf32>
    %12 = arith.addf %9, %11 : vector<256x128xf32>
    %cst_11 = arith.constant 0.000000e+00 : f32
    %13 = vector.broadcast %cst_11 : f32 to vector<256x128xf32>
    %14 = arith.maximumf %12, %13 : vector<256x128xf32>
    %c0_12 = arith.constant 0 : index
    %c0_13 = arith.constant 0 : index
    %15 = vector.load %arg6[%c0_12, %c0_13] : memref<128x128xf32, #tpu.memory_space<vmem>>, vector<128x128xf32>
    %cst_14 = arith.constant dense<0.000000e+00> : vector<256x128xf32>
    %16 = tpu.matmul %14, %15, %cst_14 {dimension_numbers = #tpu.dot_dimension_numbers<[1], [0], [0], [1], [0, 0, 1, 1], [], []>} : vector<256x128xf32>, vector<128x128xf32>, vector<256x128xf32> -> vector<256x128xf32>
    %c0_15 = arith.constant 0 : index
    %c0_16 = arith.constant 0 : index
    %17 = vector.load %arg7[%c0_15, %c0_16] : memref<1x128xf32, #tpu.memory_space<vmem>>, vector<1x128xf32>
    %18 = vector.broadcast %17 : vector<1x128xf32> to vector<256x128xf32>
    %19 = arith.addf %16, %18 : vector<256x128xf32>
    %cst_17 = arith.constant 0.000000e+00 : f32
    %20 = vector.broadcast %cst_17 : f32 to vector<256x128xf32>
    %21 = arith.maximumf %19, %20 : vector<256x128xf32>
    %c0_18 = arith.constant 0 : index
    %c0_19 = arith.constant 0 : index
    %22 = vector.load %arg8[%c0_18, %c0_19] : memref<128x128xf32, #tpu.memory_space<vmem>>, vector<128x128xf32>
    %cst_20 = arith.constant dense<0.000000e+00> : vector<256x128xf32>
    %23 = tpu.matmul %21, %22, %cst_20 {dimension_numbers = #tpu.dot_dimension_numbers<[1], [0], [0], [1], [0, 0, 1, 1], [], []>} : vector<256x128xf32>, vector<128x128xf32>, vector<256x128xf32> -> vector<256x128xf32>
    %c0_21 = arith.constant 0 : index
    %c0_22 = arith.constant 0 : index
    %24 = vector.load %arg9[%c0_21, %c0_22] : memref<1x128xf32, #tpu.memory_space<vmem>>, vector<1x128xf32>
    %25 = vector.broadcast %24 : vector<1x128xf32> to vector<256x128xf32>
    %26 = arith.addf %23, %25 : vector<256x128xf32>
    %cst_23 = arith.constant 0.000000e+00 : f32
    %27 = vector.broadcast %cst_23 : f32 to vector<256x128xf32>
    %28 = arith.maximumf %26, %27 : vector<256x128xf32>
    %c0_24 = arith.constant 0 : index
    %c0_25 = arith.constant 0 : index
    %29 = vector.load %arg10[%c0_24, %c0_25] : memref<128x128xf32, #tpu.memory_space<vmem>>, vector<128x128xf32>
    %cst_26 = arith.constant dense<0.000000e+00> : vector<256x128xf32>
    %30 = tpu.matmul %28, %29, %cst_26 {dimension_numbers = #tpu.dot_dimension_numbers<[1], [0], [0], [1], [0, 0, 1, 1], [], []>} : vector<256x128xf32>, vector<128x128xf32>, vector<256x128xf32> -> vector<256x128xf32>
    %c0_27 = arith.constant 0 : index
    %c0_28 = arith.constant 0 : index
    %31 = vector.load %arg11[%c0_27, %c0_28] : memref<1x128xf32, #tpu.memory_space<vmem>>, vector<1x128xf32>
    %32 = vector.broadcast %31 : vector<1x128xf32> to vector<256x128xf32>
    %33 = arith.addf %30, %32 : vector<256x128xf32>
    %c0_29 = arith.constant 0 : index
    %c0_30 = arith.constant 0 : index
    %34 = vector.load %arg12[%c0_29, %c0_30] : memref<256x128xf32, #tpu.memory_space<vmem>>, vector<256x128xf32>
    tpu.vector_store %arg12[%c0_29, %c0_30], %33 {strides = array<i32>} : memref<256x128xf32, #tpu.memory_space<vmem>>, vector<256x128xf32>,
    return
  }
  func.func @transform_0(%arg0: i32) -> (i32, i32) {
    %c0_i32 = arith.constant 0 : i32
    %c0_i32_0 = arith.constant 0 : i32
    return %arg0, %c0_i32 : i32, i32
  }
  func.func @transform_1(%arg0: i32) -> (i32, i32) {
    %c0_i32 = arith.constant 0 : i32
    %c0_i32_0 = arith.constant 0 : i32
    %c0_i32_1 = arith.constant 0 : i32
    return %c0_i32, %c0_i32_0 : i32, i32
  }
  func.func @transform_2(%arg0: i32) -> (i32, i32) {
    %c0_i32 = arith.constant 0 : i32
    %c0_i32_0 = arith.constant 0 : i32
    %c0_i32_1 = arith.constant 0 : i32
    return %c0_i32, %c0_i32_0 : i32, i32
  }
  func.func @transform_3(%arg0: i32) -> (i32, i32) {
    %c0_i32 = arith.constant 0 : i32
    %c0_i32_0 = arith.constant 0 : i32
    %c0_i32_1 = arith.constant 0 : i32
    return %c0_i32, %c0_i32_0 : i32, i32
  }
  func.func @transform_4(%arg0: i32) -> (i32, i32) {
    %c0_i32 = arith.constant 0 : i32
    %c0_i32_0 = arith.constant 0 : i32
    %c0_i32_1 = arith.constant 0 : i32
    return %c0_i32, %c0_i32_0 : i32, i32
  }
  func.func @transform_5(%arg0: i32) -> (i32, i32) {
    %c0_i32 = arith.constant 0 : i32
    %c0_i32_0 = arith.constant 0 : i32
    %c0_i32_1 = arith.constant 0 : i32
    return %c0_i32, %c0_i32_0 : i32, i32
  }
  func.func @transform_6(%arg0: i32) -> (i32, i32) {
    %c0_i32 = arith.constant 0 : i32
    %c0_i32_0 = arith.constant 0 : i32
    %c0_i32_1 = arith.constant 0 : i32
    return %c0_i32, %c0_i32_0 : i32, i32
  }
  func.func @transform_7(%arg0: i32) -> (i32, i32) {
    %c0_i32 = arith.constant 0 : i32
    %c0_i32_0 = arith.constant 0 : i32
    %c0_i32_1 = arith.constant 0 : i32
    return %c0_i32, %c0_i32_0 : i32, i32
  }
  func.func @transform_8(%arg0: i32) -> (i32, i32) {
    %c0_i32 = arith.constant 0 : i32
    %c0_i32_0 = arith.constant 0 : i32
    %c0_i32_1 = arith.constant 0 : i32
    return %c0_i32, %c0_i32_0 : i32, i32
  }
  func.func @transform_9(%arg0: i32) -> (i32, i32) {
    %c0_i32 = arith.constant 0 : i32
    %c0_i32_0 = arith.constant 0 : i32
    %c0_i32_1 = arith.constant 0 : i32
    return %c0_i32, %c0_i32_0 : i32, i32
  }
  func.func @transform_10(%arg0: i32) -> (i32, i32) {
    %c0_i32 = arith.constant 0 : i32
    %c0_i32_0 = arith.constant 0 : i32
    %c0_i32_1 = arith.constant 0 : i32
    return %c0_i32, %c0_i32_0 : i32, i32
  }
  func.func @transform_11(%arg0: i32) -> (i32, i32) {
    %c0_i32 = arith.constant 0 : i32
    %c0_i32_0 = arith.constant 0 : i32
    return %arg0, %c0_i32 : i32, i32
  }
}

</mosaic_0001>

<bundles_post_ra>
// kernel: baseline_nn_forward.1
= control target key start
LH: loop header
LB: loop body
LE: loop exit
PB: predicated region body
PF: predicated region fallthrough
CT: control target
= control target key end

     0   :  { %s2786_s17 = smov 0   ;;  %s3324_s0 = inlined_call_operand.vmem [shape: f32[512,128], index: 0, kind: input, shape index: {}]   ;;  %s3325_s1 = inlined_call_operand.vmem [shape: f32[128,128], index: 1, kind: input, shape index: {}]   ;;  %s3326_s2 = inlined_call_operand.vmem [shape: f32[1,128], index: 2, kind: input, shape index: {}]   ;;  %s3327_s3 = inlined_call_operand.vmem [shape: f32[128,128], index: 3, kind: input, shape index: {}]   ;;  %s3328_s4 = inlined_call_operand.vmem [shape: f32[1,128], index: 4, kind: input, shape index: {}]   ;;  %s3329_s5 = inlined_call_operand.vmem [shape: f32[128,128], index: 5, kind: input, shape index: {}]   ;;  %s3330_s6 = inlined_call_operand.vmem [shape: f32[1,128], index: 6, kind: input, shape index: {}]   ;;  %s3331_s7 = inlined_call_operand.vmem [shape: f32[128,128], index: 7, kind: input, shape index: {}]   ;;  %s3332_s8 = inlined_call_operand.vmem [shape: f32[1,128], index: 8, kind: input, shape index: {}]   ;;  %s3333_s9 = inlined_call_operand.vmem [shape: f32[128,128], index: 9, kind: input, shape index: {}]   ;;  %s3334_s10 = inlined_call_operand.vmem [shape: f32[1,128], index: 10, kind: input, shape index: {}]   ;;  %s3335_s11 = inlined_call_operand.vmem [shape: f32[512,128], index: 11, kind: output, shape index: {}]  }
   0x1 LB: > { %s1878_s18 = sadd.s32 4294967295, %s2724_s17   ;;  %p1882_p0 = scmp.ge.s32.totalorder %s2724_s17, 1  ;;  %s2724_s17 = sphi %s2786_s17, %s21_s17  }
   0x2   : > { %p338_p1 = scmp.lt.s32.totalorder %s2724_s17, 3 }
   0x4   : > { %p339_p2 = pnand %p1882_p0, %p338_p1 }
   0x5   : > { %v422_v0 = vld [vmem:[%s3325_s1] sm:$0xff] (!%p339_p2)  ;;  %v423_v1 = vld [vmem:[%s3325_s1 + $0x8] sm:$0xff] (!%p339_p2)  ;;  %v424_v2 = vld [vmem:[%s3325_s1 + $0x10] sm:$0xff] (!%p339_p2)  ;;  %s1883_s25 = sshll.u32 (!%p339_p2), %s1878_s18, 5 }
   0x6   : > { %342 = sbr.rel (%p339_p2) target bundleno = 1188 (0x4a4), region = 64  ;;  %v2534_v3 = vpack.c.bf16 (!%p339_p2), %v423_v1, %v422_v0  ;;  %v425_v4 = vld [vmem:[%s3325_s1 + $0x18] sm:$0xff] (!%p339_p2)  ;;  %p379_p3 = scmp.lt.s32.totalorder (!%p339_p2), %s1883_s25, 63  ;;  %v426_v6 = vld [vmem:[%s3325_s1 + $0x20] sm:$0xff] (!%p339_p2)  ;;  %v427_v7 = vld [vmem:[%s3325_s1 + $0x28] sm:$0xff] (!%p339_p2) }
   0x7   : > { %v2538_v5 = vpack.c.bf16 (!%p339_p2), %v425_v4, %v424_v2  ;;  %v2542_v8 = vpack.c.bf16 (!%p339_p2), %v427_v7, %v426_v6  ;;  %v428_v9 = vld [vmem:[%s3325_s1 + $0x30] sm:$0xff] (!%p339_p2)  ;;  %v429_v10 = vld [vmem:[%s3325_s1 + $0x38] sm:$0xff] (!%p339_p2)  ;;  %v430_v13 = vld [vmem:[%s3325_s1 + $0x40] sm:$0xff] (!%p339_p2) }
   0x8   : > { %2535 = vmatprep.subr.bf16.mxu0 (!%p339_p2), %v2534_v3  ;;  %2694 = vmatprep.subr.bf16.mxu1 (!%p339_p2), %v2534_v3  ;;  %v2546_v12 = vpack.c.bf16 (!%p339_p2), %v429_v10, %v428_v9  ;;  %v431_v14 = vld [vmem:[%s3325_s1 + $0x48] sm:$0xff] (!%p339_p2)  ;;  %v432_v17 = vld [vmem:[%s3325_s1 + $0x50] sm:$0xff] (!%p339_p2)  ;;  %v433_v18 = vld [vmem:[%s3325_s1 + $0x58] sm:$0xff] (!%p339_p2) }
   0x9   : > { %2537 = vmatpush3.bf16.msra.mxu0 (!%p339_p2), %v2534_v3  ;;  %2702 = vmatpush3.bf16.msra.mxu1 (!%p339_p2), %v2534_v3  ;;  %v2550_v16 = vpack.c.bf16 (!%p339_p2), %v431_v14, %v430_v13  ;;  %v2554_v19 = vpack.c.bf16 (!%p339_p2), %v433_v18, %v432_v17  ;;  %v434_v20 = vld [vmem:[%s3325_s1 + $0x60] sm:$0xff] (!%p339_p2)  ;;  %v435_v21 = vld [vmem:[%s3325_s1 + $0x68] sm:$0xff] (!%p339_p2)  ;;  %v436_v23 = vld [vmem:[%s3325_s1 + $0x70] sm:$0xff] (!%p339_p2) }
   0xa   : > { %2539 = vmatprep.subr.bf16.mxu0 (!%p339_p2), %v2538_v5  ;;  %2695 = vmatprep.subr.bf16.mxu1 (!%p339_p2), %v2538_v5  ;;  %v2558_v22 = vpack.c.bf16 (!%p339_p2), %v435_v21, %v434_v20  ;;  %v437_v24 = vld [vmem:[%s3325_s1 + $0x78] sm:$0xff] (!%p339_p2)  ;;  %v702_v26 = vld [vmem:[%s3327_s3] sm:$0xff] (!%p339_p2)  ;;  %v703_v27 = vld [vmem:[%s3327_s3 + $0x8] sm:$0xff] (!%p339_p2) }
   0xb   : > { %v2562_v25 = vpack.c.bf16 (!%p339_p2), %v437_v24, %v436_v23  ;;  %v2566_v28 = vpack.c.bf16 (!%p339_p2), %v703_v27, %v702_v26  ;;  %v704_v29 = vld [vmem:[%s3327_s3 + $0x10] sm:$0xff] (!%p339_p2)  ;;  %v705_v30 = vld [vmem:[%s3327_s3 + $0x18] sm:$0xff] (!%p339_p2)  ;;  %v706_v36 = vld [vmem:[%s3327_s3 + $0x20] sm:$0xff] (!%p339_p2) }
   0xc   : > { %v2570_v35 = vpack.c.bf16 (!%p339_p2), %v705_v30, %v704_v29  ;;  %v707_v37 = vld [vmem:[%s3327_s3 + $0x28] sm:$0xff] (!%p339_p2)  ;;  %v708_v43 = vld [vmem:[%s3327_s3 + $0x30] sm:$0xff] (!%p339_p2)  ;;  %v709_v44 = vld [vmem:[%s3327_s3 + $0x38] sm:$0xff] (!%p339_p2) }
   0xd   : > { %s3337_s25 = smov (!%p379_p3, %s1883_s25), 63  ;;  %2541 = vmatpush3.bf16.msra.mxu0 %v2538_v5  ;;  %2703 = vmatpush3.bf16.msra.mxu1 %v2538_v5  ;;  %v2574_v42 = vpack.c.bf16 %v707_v37, %v706_v36  ;;  %v2578_v49 = vpack.c.bf16 %v709_v44, %v708_v43  ;;  %v710_v50 = vld [vmem:[%s3327_s3 + $0x40] sm:$0xff]  ;;  %v711_v51 = vld [vmem:[%s3327_s3 + $0x48] sm:$0xff]  ;;  %v712_v57 = vld [vmem:[%s3327_s3 + $0x50] sm:$0xff] }
   0xe   : > { %s1884_s13 = sshll.u32 %s3337_s25, 3  ;;  %2543 = vmatprep.subr.bf16.mxu0 %v2542_v8  ;;  %2696 = vmatprep.subr.bf16.mxu1 %v2542_v8  ;;  %v2582_v56 = vpack.c.bf16 %v711_v51, %v710_v50  ;;  %v713_v58 = vld [vmem:[%s3327_s3 + $0x58] sm:$0xff]  ;;  %v714_v0 = vld [vmem:[%s3327_s3 + $0x60] sm:$0xff]  ;;  %v715_v1 = vld [vmem:[%s3327_s3 + $0x68] sm:$0xff] }
   0xf   : > { %s2826_s21 = scalar_lea.vmem %s3324_s0, %s1884_s13  ;;  %v2586_v63 = vpack.c.bf16 %v713_v58, %v712_v57  ;;  %v2590_v6 = vpack.c.bf16 %v715_v1, %v714_v0  ;;  %v716_v13 = vld [vmem:[%s3327_s3 + $0x70] sm:$0xff]  ;;  %v717_v14 = vld [vmem:[%s3327_s3 + $0x78] sm:$0xff]  ;;  %v983_v17 = vld [vmem:[%s3329_s5 + $0x8] sm:$0xff]  ;;  %s3255_s20 = scalar_lea.vmem %s3335_s11, %s1884_s13 }
  0x10   : > { %v390_v11 = vld [vmem:[%s2826_s21] sm:$0xff]  ;;  %v391_v31 = vld [vmem:[%s2826_s21 + $0x8] sm:$0xff]  ;;  %v392_v32 = vld [vmem:[%s2826_s21 + $0x10] sm:$0xff] }
  0x11   : > { %2166 = vmatprep.mubr.f32.mxu0 %v390_v11  ;;  %2545 = vmatpush3.bf16.msra.mxu0 %v2542_v8  ;;  %v406_v15 = vld [vmem:[%s2826_s21 + $0x80] sm:$0xff]  ;;  %v407_v33 = vld [vmem:[%s2826_s21 + $0x88] sm:$0xff]  ;;  %v408_v34 = vld [vmem:[%s2826_s21 + $0x90] sm:$0xff] }
  0x12   : > { %2547 = vmatprep.subr.bf16.mxu0 %v2546_v12  ;;  %2704 = vmatpush3.bf16.msra.mxu1 %v2542_v8  ;;  %v393_v38 = vld [vmem:[%s2826_s21 + $0x18] sm:$0xff]  ;;  %v394_v39 = vld [vmem:[%s2826_s21 + $0x20] sm:$0xff]  ;;  %v395_v45 = vld [vmem:[%s2826_s21 + $0x28] sm:$0xff] }
  0x13   : > { %2697 = vmatprep.subr.bf16.mxu1 %v2546_v12  ;;  %2190 = vmatprep.mubr.f32.mxu1 %v406_v15  ;;  %v409_v40 = vld [vmem:[%s2826_s21 + $0x98] sm:$0xff]  ;;  %v410_v41 = vld [vmem:[%s2826_s21 + $0xa0] sm:$0xff]  ;;  %v396_v46 = vld [vmem:[%s2826_s21 + $0x30] sm:$0xff]  ;;  %v2594_v15 = vpack.c.bf16 %v717_v14, %v716_v13 }
  0x14   : > { %v411_v47 = vld [vmem:[%s2826_s21 + $0xa8] sm:$0xff]  ;;  %v412_v48 = vld [vmem:[%s2826_s21 + $0xb0] sm:$0xff]  ;;  %v397_v52 = vld [vmem:[%s2826_s21 + $0x38] sm:$0xff] }
  0x15   : > { %2549 = vmatpush3.bf16.msra.mxu0 %v2546_v12  ;;  %v398_v53 = vld [vmem:[%s2826_s21 + $0x40] sm:$0xff]  ;;  %v413_v54 = vld [vmem:[%s2826_s21 + $0xb8] sm:$0xff]  ;;  %v399_v59 = vld [vmem:[%s2826_s21 + $0x48] sm:$0xff] }
  0x16   : > { %2551 = vmatprep.subr.bf16.mxu0 %v2550_v16  ;;  %2705 = vmatpush3.bf16.msra.mxu1 %v2546_v12  ;;  %v414_v55 = vld [vmem:[%s2826_s21 + $0xc0] sm:$0xff]  ;;  %v400_v60 = vld [vmem:[%s2826_s21 + $0x50] sm:$0xff]  ;;  %v415_v61 = vld [vmem:[%s2826_s21 + $0xc8] sm:$0xff] }
  0x17   : > { %2698 = vmatprep.subr.bf16.mxu1 %v2550_v16  ;;  %v416_v62 = vld [vmem:[%s2826_s21 + $0xd0] sm:$0xff]  ;;  %v401_v2 = vld [vmem:[%s2826_s21 + $0x58] sm:$0xff]  ;;  %v402_v3 = vld [vmem:[%s2826_s21 + $0x60] sm:$0xff] }
  0x18   : > { %v417_v4 = vld [vmem:[%s2826_s21 + $0xd8] sm:$0xff]  ;;  %v418_v5 = vld [vmem:[%s2826_s21 + $0xe0] sm:$0xff]  ;;  %v403_v7 = vld [vmem:[%s2826_s21 + $0x68] sm:$0xff] }
  0x19   : > { %2553 = vmatpush3.bf16.msra.mxu0 %v2550_v16  ;;  %v404_v8 = vld [vmem:[%s2826_s21 + $0x70] sm:$0xff]  ;;  %v419_v9 = vld [vmem:[%s2826_s21 + $0xe8] sm:$0xff]  ;;  %v405_v11 = vld [vmem:[%s2826_s21 + $0x78] sm:$0xff] }
  0x1a   : > { %2555 = vmatprep.subr.bf16.mxu0 %v2554_v19  ;;  %2706 = vmatpush3.bf16.msra.mxu1 %v2550_v16  ;;  %v420_v10 = vld [vmem:[%s2826_s21 + $0xf0] sm:$0xff]  ;;  %v421_v12 = vld [vmem:[%s2826_s21 + $0xf8] sm:$0xff]  ;;  %v982_v16 = vld [vmem:[%s3329_s5] sm:$0xff] }
  0x1b   : > { %2699 = vmatprep.subr.bf16.mxu1 %v2554_v19  ;;  %v984_v18 = vld [vmem:[%s3329_s5 + $0x10] sm:$0xff]  ;;  %v985_v20 = vld [vmem:[%s3329_s5 + $0x18] sm:$0xff]  ;;  %v987_v23 = vld [vmem:[%s3329_s5 + $0x28] sm:$0xff] }
  0x1c   : > { %v2602_v21 = vpack.c.bf16 %v985_v20, %v984_v18  ;;  %v989_v26 = vld [vmem:[%s3329_s5 + $0x38] sm:$0xff]  ;;  %v991_v29 = vld [vmem:[%s3329_s5 + $0x48] sm:$0xff]  ;;  %v2977_v37 = vld [vmem:[%s3326_s2] ss:$0 sm:$0xff] }
  0x1d   : > { %2557 = vmatpush3.bf16.msra.mxu0 %v2554_v19 }
  0x1e   : > { %2559 = vmatprep.subr.bf16.mxu0 %v2558_v22  ;;  %2707 = vmatpush3.bf16.msra.mxu1 %v2554_v19  ;;  %v2598_v19 = vpack.c.bf16 %v983_v17, %v982_v16 }
  0x1f   : > { %2700 = vmatprep.subr.bf16.mxu1 %v2558_v22 }
  0x21   : > { %2561 = vmatpush3.bf16.msra.mxu0 %v2558_v22 }
  0x22   : > { %2563 = vmatprep.subr.bf16.mxu0 %v2562_v25  ;;  %2708 = vmatpush3.bf16.msra.mxu1 %v2558_v22  ;;  %v986_v22 = vld [vmem:[%s3329_s5 + $0x20] sm:$0xff] }
  0x23   : > { %2701 = vmatprep.subr.bf16.mxu1 %v2562_v25  ;;  %v2606_v24 = vpack.c.bf16 %v987_v23, %v986_v22 }
  0x25   : > { %2565 = vmatpush3.bf16.msra.mxu0 %v2562_v25 }
  0x26   : > { %2709 = vmatpush3.bf16.msra.mxu1 %v2562_v25  ;;  %2599 = vmatprep.subr.bf16.mxu0 %v2598_v19  ;;  %v988_v25 = vld [vmem:[%s3329_s5 + $0x30] sm:$0xff] }
  0x27   : > { %2567 = vmatprep.subr.bf16.mxu1 %v2566_v28  ;;  %v2610_v27 = vpack.c.bf16 %v989_v26, %v988_v25 }
  0x28   : > { %2167 = vmatmul.mubr.f32.vlgmr.msra.gmra.mrb[0].mxu0 %v391_v31  ;;  %v992_v31 = vld [vmem:[%s3329_s5 + $0x50] sm:$0xff] }
  0x29   : > { %2169 = vmatprep.mubr.f32.mxu0 %v392_v32  ;;  %2191 = vmatmul.mubr.f32.vlgmr.msra.gmra.mrb[0].mxu1 %v407_v33  ;;  %v993_v32 = vld [vmem:[%s3329_s5 + $0x58] sm:$0xff] }
  0x2a   : > { %2193 = vmatprep.mubr.f32.mxu1 %v408_v34  ;;  %2569 = vmatpush3.bf16.msra.mxu1 %v2566_v28  ;;  %v990_v28 = vld [vmem:[%s3329_s5 + $0x40] sm:$0xff]  ;;  %v2618_v33 = vpack.c.bf16 %v993_v32, %v992_v31 }
  0x2b   : > { %2571 = vmatprep.subr.bf16.mxu1 %v2570_v35  ;;  %2601 = vmatpush3.bf16.msra.mxu0 %v2598_v19  ;;  %v2614_v30 = vpack.c.bf16 %v991_v29, %v990_v28  ;;  %v994_v34 = vld [vmem:[%s3329_s5 + $0x60] sm:$0xff] }
  0x2c   : > { %2170 = vmatmul.mubr.f32.gmra.mrb[2].mxu0 %v393_v38  ;;  %2603 = vmatprep.subr.bf16.mxu0 %v2602_v21 }
  0x2d   : > { %2172 = vmatprep.mubr.f32.mxu0 %v394_v39  ;;  %2194 = vmatmul.mubr.f32.gmra.mrb[2].mxu1 %v409_v40 }
  0x2e   : > { %2196 = vmatprep.mubr.f32.mxu1 %v410_v41  ;;  %2573 = vmatpush3.bf16.msra.mxu1 %v2570_v35  ;;  %v995_v35 = vld [vmem:[%s3329_s5 + $0x68] sm:$0xff] }
  0x2f   : > { %2575 = vmatprep.subr.bf16.mxu1 %v2574_v42  ;;  %2605 = vmatpush3.bf16.msra.mxu0 %v2602_v21  ;;  %v2622_v36 = vpack.c.bf16 %v995_v35, %v994_v34 }
  0x30   : > { %2173 = vmatmul.mubr.f32.gmra.mrb[4].mxu0 %v395_v45  ;;  %2607 = vmatprep.subr.bf16.mxu0 %v2606_v24 }
  0x31   : > { %2175 = vmatprep.mubr.f32.mxu0 %v396_v46  ;;  %2197 = vmatmul.mubr.f32.gmra.mrb[4].mxu1 %v411_v47 }
  0x32   : > { %2199 = vmatprep.mubr.f32.mxu1 %v412_v48  ;;  %2577 = vmatpush3.bf16.msra.mxu1 %v2574_v42 }
  0x33   : > { %2579 = vmatprep.subr.bf16.mxu1 %v2578_v49  ;;  %2609 = vmatpush3.bf16.msra.mxu0 %v2606_v24 }
  0x34   : > { %2176 = vmatmul.mubr.f32.gmra.mrb[6].mxu0 %v397_v52  ;;  %2611 = vmatprep.subr.bf16.mxu0 %v2610_v27 }
  0x35   : > { %2178 = vmatprep.mubr.f32.mxu0 %v398_v53  ;;  %2200 = vmatmul.mubr.f32.gmra.mrb[6].mxu1 %v413_v54 }
  0x36   : > { %2202 = vmatprep.mubr.f32.mxu1 %v414_v55  ;;  %2581 = vmatpush3.bf16.msra.mxu1 %v2578_v49 }
  0x37   : > { %2583 = vmatprep.subr.bf16.mxu1 %v2582_v56  ;;  %2613 = vmatpush3.bf16.msra.mxu0 %v2610_v27 }
  0x38   : > { %2179 = vmatmul.mubr.f32.gmra.mrb[8].mxu0 %v399_v59  ;;  %2615 = vmatprep.subr.bf16.mxu0 %v2614_v30 }
  0x39   : > { %2181 = vmatprep.mubr.f32.mxu0 %v400_v60  ;;  %2203 = vmatmul.mubr.f32.gmra.mrb[8].mxu1 %v415_v61 }
  0x3a   : > { %2205 = vmatprep.mubr.f32.mxu1 %v416_v62  ;;  %2585 = vmatpush3.bf16.msra.mxu1 %v2582_v56 }
  0x3b   : > { %2587 = vmatprep.subr.bf16.mxu1 %v2586_v63  ;;  %2617 = vmatpush3.bf16.msra.mxu0 %v2614_v30 }
  0x3c   : > { %2182 = vmatmul.mubr.f32.gmra.mrb[10].mxu0 %v401_v2  ;;  %2619 = vmatprep.subr.bf16.mxu0 %v2618_v33 }
  0x3d   : > { %2184 = vmatprep.mubr.f32.mxu0 %v402_v3  ;;  %2206 = vmatmul.mubr.f32.gmra.mrb[10].mxu1 %v417_v4 }
  0x3e   : > { %2208 = vmatprep.mubr.f32.mxu1 %v418_v5  ;;  %2589 = vmatpush3.bf16.msra.mxu1 %v2586_v63 }
  0x3f   : > { %2591 = vmatprep.subr.bf16.mxu1 %v2590_v6  ;;  %2621 = vmatpush3.bf16.msra.mxu0 %v2618_v33 }
  0x40   : > { %2185 = vmatmul.mubr.f32.gmra.mrb[12].mxu0 %v403_v7  ;;  %2623 = vmatprep.subr.bf16.mxu0 %v2622_v36 }
  0x41   : > { %2187 = vmatprep.mubr.f32.mxu0 %v404_v8  ;;  %2209 = vmatmul.mubr.f32.gmra.mrb[12].mxu1 %v419_v9 }
  0x42   : > { %2211 = vmatprep.mubr.f32.mxu1 %v420_v10  ;;  %2593 = vmatpush3.bf16.msra.mxu1 %v2590_v6 }
  0x43   : > { %2595 = vmatprep.subr.bf16.mxu1 %v2594_v15  ;;  %2625 = vmatpush3.bf16.msra.mxu0 %v2622_v36 }
  0x44   : > { %2188 = vmatmul.mubr.f32.gmra.mrb[14].mxu0 %v405_v11 }
  0x45   : > { %2212 = vmatmul.mubr.f32.gmra.mrb[14].mxu1 %v421_v12 }
  0x46   : > { %2597 = vmatpush3.bf16.msra.mxu1 %v2594_v15 }
  0xfb   : > { %v2168_v38 = vpop.f32.mrb[0].mxu0 }
  0xfc   : > { %v517_v39 = vadd.f32 %v2168_v38, %v2977_v37  ;;  %v511_v40 = vpop.f32.mrb[1].mxu0  ;;  %v2980_v41 = vpop.f32.mrb[0].mxu1 }
  0xfd   : > { %v512_v42 = vadd.f32 %v2977_v37, %v511_v40  ;;  %v2983_v43 = vpop.f32.mrb[1].mxu1 }
  0xfe   : > { %v671_v46 = vmax.f32 %v517_v39, 0.0  ;;  %v592_v30 = vadd.f32 %v2977_v37, %v2983_v43 }
  0xff   : > { %v670_v44 = vmax.f32 %v512_v42, 0.0  ;;  %v2171_v45 = vpop.f32.mrb[2].mxu0 }
 0x100   : > { %v527_v47 = vadd.f32 %v2171_v45, %v2977_v37  ;;  %v521_v48 = vpop.f32.mrb[3].mxu0  ;;  %v2986_v49 = vpop.f32.mrb[2].mxu1  ;;  %v686_v39 = vmax.f32 %v592_v30, 0.0  ;;  %v1276_v30 = vld [vmem:[%s3331_s7 + $0x70] sm:$0xff] }
 0x101   : > { %v522_v50 = vadd.f32 %v2977_v37, %v521_v48  ;;  %2246 = vmatprep.mubr.f32.mxu1 %v670_v44  ;;  %v2989_v51 = vpop.f32.mrb[3].mxu1  ;;  %v597_v44 = vadd.f32 %v2980_v41, %v2977_v37 }
 0x102   : > { %2247 = vmatmul.mubr.f32.vlgmr.msra.gmra.mrb[16].mxu1 %v671_v46  ;;  %v673_v54 = vmax.f32 %v527_v47, 0.0  ;;  %v602_v40 = vadd.f32 %v2977_v37, %v2989_v51  ;;  %v607_v47 = vadd.f32 %v2986_v49, %v2977_v37 }
 0x103   : > { %v672_v52 = vmax.f32 %v522_v50, 0.0  ;;  %v2174_v53 = vpop.f32.mrb[4].mxu0  ;;  %v687_v46 = vmax.f32 %v597_v44, 0.0 }
 0x104   : > { %v537_v55 = vadd.f32 %v2174_v53, %v2977_v37  ;;  %v531_v56 = vpop.f32.mrb[5].mxu0  ;;  %v2992_v57 = vpop.f32.mrb[4].mxu1  ;;  %v688_v43 = vmax.f32 %v602_v40, 0.0  ;;  %v689_v51 = vmax.f32 %v607_v47, 0.0 }
 0x105   : > { %v532_v58 = vadd.f32 %v2977_v37, %v531_v56  ;;  %2249 = vmatprep.mubr.f32.mxu1 %v672_v52  ;;  %v611_v59 = vpop.f32.mrb[5].mxu1  ;;  %v617_v52 = vadd.f32 %v2992_v57, %v2977_v37 }
 0x106   : > { %2250 = vmatmul.mubr.f32.gmra.mrb[18].mxu1 %v673_v54  ;;  %v675_v62 = vmax.f32 %v537_v55, 0.0  ;;  %v612_v45 = vadd.f32 %v2977_v37, %v611_v59 }
 0x107   : > { %v674_v60 = vmax.f32 %v532_v58, 0.0  ;;  %v2177_v61 = vpop.f32.mrb[6].mxu0  ;;  %v691_v54 = vmax.f32 %v617_v52, 0.0 }
 0x108   : > { %v547_v63 = vadd.f32 %v2177_v61, %v2977_v37  ;;  %v541_v0 = vpop.f32.mrb[7].mxu0  ;;  %v2996_v1 = vpop.f32.mrb[6].mxu1  ;;  %v690_v48 = vmax.f32 %v612_v45, 0.0 }
 0x109   : > { %v542_v2 = vadd.f32 %v2977_v37, %v541_v0  ;;  %2252 = vmatprep.mubr.f32.mxu1 %v674_v60  ;;  %v621_v3 = vpop.f32.mrb[7].mxu1  ;;  %v627_v55 = vadd.f32 %v2996_v1, %v2977_v37 }
 0x10a   : > { %2253 = vmatmul.mubr.f32.gmra.mrb[20].mxu1 %v675_v62  ;;  %v677_v6 = vmax.f32 %v547_v63, 0.0  ;;  %v622_v50 = vadd.f32 %v2977_v37, %v621_v3 }
 0x10b   : > { %v676_v4 = vmax.f32 %v542_v2, 0.0  ;;  %v2180_v5 = vpop.f32.mrb[8].mxu0  ;;  %v693_v58 = vmax.f32 %v627_v55, 0.0 }
 0x10c   : > { %v557_v7 = vadd.f32 %v2180_v5, %v2977_v37  ;;  %v551_v8 = vpop.f32.mrb[9].mxu0  ;;  %v3000_v9 = vpop.f32.mrb[8].mxu1  ;;  %v692_v41 = vmax.f32 %v622_v50, 0.0 }
 0x10d   : > { %v552_v10 = vadd.f32 %v2977_v37, %v551_v8  ;;  %2255 = vmatprep.mubr.f32.mxu1 %v676_v4  ;;  %v631_v11 = vpop.f32.mrb[9].mxu1  ;;  %v637_v59 = vadd.f32 %v3000_v9, %v2977_v37  ;;  %v997_v8 = vld [vmem:[%s3329_s5 + $0x78] sm:$0xff] }
 0x10e   : > { %2256 = vmatmul.mubr.f32.gmra.mrb[22].mxu1 %v677_v6  ;;  %v679_v14 = vmax.f32 %v557_v7, 0.0  ;;  %v632_v53 = vadd.f32 %v2977_v37, %v631_v11  ;;  %v996_v7 = vld [vmem:[%s3329_s5 + $0x70] sm:$0xff] }
 0x10f   : > { %v678_v12 = vmax.f32 %v552_v10, 0.0  ;;  %v2183_v13 = vpop.f32.mrb[10].mxu0  ;;  %v695_v61 = vmax.f32 %v637_v59, 0.0  ;;  %v2626_v9 = vpack.c.bf16 %v997_v8, %v996_v7  ;;  %v1262_v10 = vld [vmem:[%s3331_s7] sm:$0xff]  ;;  %v1264_v11 = vld [vmem:[%s3331_s7 + $0x10] sm:$0xff] }
 0x110   : > { %v567_v15 = vadd.f32 %v2183_v13, %v2977_v37  ;;  %v561_v16 = vpop.f32.mrb[11].mxu0  ;;  %v2207_v17 = vpop.f32.mrb[10].mxu1  ;;  %v694_v49 = vmax.f32 %v632_v53, 0.0  ;;  %v1265_v13 = vld [vmem:[%s3331_s7 + $0x18] sm:$0xff] }
 0x111   : > { %v562_v18 = vadd.f32 %v2977_v37, %v561_v16  ;;  %2258 = vmatprep.mubr.f32.mxu1 %v678_v12  ;;  %v641_v19 = vpop.f32.mrb[11].mxu1  ;;  %v647_v62 = vadd.f32 %v2207_v17, %v2977_v37  ;;  %2627 = vmatprep.subr.bf16.mxu0 %v2626_v9  ;;  %v1267_v16 = vld [vmem:[%s3331_s7 + $0x28] sm:$0xff] }
 0x112   : > { %2259 = vmatmul.mubr.f32.gmra.mrb[24].mxu1 %v679_v14  ;;  %v681_v22 = vmax.f32 %v567_v15, 0.0  ;;  %v642_v56 = vadd.f32 %v2977_v37, %v641_v19  ;;  %2629 = vmatpush3.bf16.msra.mxu0 %v2626_v9  ;;  %v2634_v14 = vpack.c.bf16 %v1265_v13, %v1264_v11  ;;  %v1266_v15 = vld [vmem:[%s3331_s7 + $0x20] sm:$0xff]  ;;  %v1269_v19 = vld [vmem:[%s3331_s7 + $0x38] sm:$0xff] }
 0x113   : > { %v680_v20 = vmax.f32 %v562_v18, 0.0  ;;  %v2186_v21 = vpop.f32.mrb[12].mxu0  ;;  %v697_v1 = vmax.f32 %v647_v62, 0.0  ;;  %v2638_v17 = vpack.c.bf16 %v1267_v16, %v1266_v15  ;;  %v1268_v18 = vld [vmem:[%s3331_s7 + $0x30] sm:$0xff] }
 0x114   : > { %v577_v23 = vadd.f32 %v2186_v21, %v2977_v37  ;;  %v571_v24 = vpop.f32.mrb[13].mxu0  ;;  %v2210_v25 = vpop.f32.mrb[12].mxu1  ;;  %v696_v57 = vmax.f32 %v642_v56, 0.0  ;;  %v1270_v21 = vld [vmem:[%s3331_s7 + $0x40] sm:$0xff] }
 0x115   : > { %v572_v26 = vadd.f32 %v2977_v37, %v571_v24  ;;  %2261 = vmatprep.mubr.f32.mxu1 %v680_v20  ;;  %v651_v27 = vpop.f32.mrb[13].mxu1  ;;  %v657_v2 = vadd.f32 %v2210_v25, %v2977_v37  ;;  %v2642_v20 = vpack.c.bf16 %v1269_v19, %v1268_v18  ;;  %v1272_v24 = vld [vmem:[%s3331_s7 + $0x50] sm:$0xff]  ;;  %v1273_v25 = vld [vmem:[%s3331_s7 + $0x58] sm:$0xff] }
 0x116   : > { %2262 = vmatmul.mubr.f32.gmra.mrb[26].mxu1 %v681_v22  ;;  %v683_v31 = vmax.f32 %v577_v23, 0.0  ;;  %v652_v60 = vadd.f32 %v2977_v37, %v651_v27  ;;  %v1271_v22 = vld [vmem:[%s3331_s7 + $0x48] sm:$0xff]  ;;  %v1274_v27 = vld [vmem:[%s3331_s7 + $0x60] sm:$0xff] }
 0x117   : > { %v682_v28 = vmax.f32 %v572_v26, 0.0  ;;  %v2189_v29 = vpop.f32.mrb[14].mxu0  ;;  %v699_v4 = vmax.f32 %v657_v2, 0.0  ;;  %v2646_v23 = vpack.c.bf16 %v1271_v22, %v1270_v21  ;;  %v2650_v26 = vpack.c.bf16 %v1273_v25, %v1272_v24 }
 0x118   : > { %v587_v32 = vadd.f32 %v2189_v29, %v2977_v37  ;;  %v581_v33 = vpop.f32.mrb[15].mxu0  ;;  %v2213_v34 = vpop.f32.mrb[14].mxu1  ;;  %v698_v63 = vmax.f32 %v652_v60, 0.0 }
 0x119   : > { %v582_v35 = vadd.f32 %v2977_v37, %v581_v33  ;;  %2264 = vmatprep.mubr.f32.mxu1 %v682_v28  ;;  %v661_v36 = vpop.f32.mrb[15].mxu1  ;;  %v667_v5 = vadd.f32 %v2213_v34, %v2977_v37  ;;  %v1275_v28 = vld [vmem:[%s3331_s7 + $0x68] sm:$0xff]  ;;  %v3089_v33 = vld [vmem:[%s3328_s4] ss:$0 sm:$0xff] }
 0x11a   : > { %2265 = vmatmul.mubr.f32.gmra.mrb[28].mxu1 %v683_v31  ;;  %v685_v42 = vmax.f32 %v587_v32, 0.0  ;;  %v662_v0 = vadd.f32 %v2977_v37, %v661_v36  ;;  %v1263_v37 = vld [vmem:[%s3331_s7 + $0x8] sm:$0xff]  ;;  %v2654_v29 = vpack.c.bf16 %v1275_v28, %v1274_v27  ;;  %v1277_v31 = vld [vmem:[%s3331_s7 + $0x78] sm:$0xff] }
 0x11b   : > { %v684_v38 = vmax.f32 %v582_v35, 0.0  ;;  %v701_v6 = vmax.f32 %v667_v5, 0.0  ;;  %v2630_v12 = vpack.c.bf16 %v1263_v37, %v1262_v10  ;;  %v2658_v32 = vpack.c.bf16 %v1277_v31, %v1276_v30 }
 0x11c   : > { %v700_v3 = vmax.f32 %v662_v0, 0.0 }
 0x11d   : > { %2267 = vmatprep.mubr.f32.mxu1 %v684_v38  ;;  %2631 = vmatprep.subr.bf16.mxu1 %v2630_v12 }
 0x11e   : > { %2268 = vmatmul.mubr.f32.gmra.mrb[30].mxu1 %v685_v42 }
 0x11f   : > { %2270 = vmatprep.mubr.f32.mxu1 %v686_v39  ;;  %2633 = vmatpush3.bf16.msra.mxu1 %v2630_v12 }
 0x120   : > { %2635 = vmatprep.subr.bf16.mxu1 %v2634_v14 }
 0x122   : > { %2271 = vmatmul.mubr.f32.gmra.mrb[32].mxu1 %v687_v46 }
 0x123   : > { %2273 = vmatprep.mubr.f32.mxu1 %v688_v43  ;;  %2637 = vmatpush3.bf16.msra.mxu1 %v2634_v14 }
 0x124   : > { %2639 = vmatprep.subr.bf16.mxu1 %v2638_v17 }
 0x126   : > { %2274 = vmatmul.mubr.f32.gmra.mrb[34].mxu1 %v689_v51 }
 0x127   : > { %2276 = vmatprep.mubr.f32.mxu1 %v690_v48  ;;  %2641 = vmatpush3.bf16.msra.mxu1 %v2638_v17 }
 0x128   : > { %2643 = vmatprep.subr.bf16.mxu1 %v2642_v20 }
 0x12a   : > { %2277 = vmatmul.mubr.f32.gmra.mrb[36].mxu1 %v691_v54 }
 0x12b   : > { %2279 = vmatprep.mubr.f32.mxu1 %v692_v41  ;;  %2645 = vmatpush3.bf16.msra.mxu1 %v2642_v20 }
 0x12c   : > { %2647 = vmatprep.subr.bf16.mxu1 %v2646_v23 }
 0x12e   : > { %2280 = vmatmul.mubr.f32.gmra.mrb[38].mxu1 %v693_v58 }
 0x12f   : > { %2282 = vmatprep.mubr.f32.mxu1 %v694_v49  ;;  %2649 = vmatpush3.bf16.msra.mxu1 %v2646_v23 }
 0x130   : > { %2651 = vmatprep.subr.bf16.mxu1 %v2650_v26 }
 0x132   : > { %2283 = vmatmul.mubr.f32.gmra.mrb[40].mxu1 %v695_v61 }
 0x133   : > { %2285 = vmatprep.mubr.f32.mxu1 %v696_v57  ;;  %2653 = vmatpush3.bf16.msra.mxu1 %v2650_v26 }
 0x134   : > { %2655 = vmatprep.subr.bf16.mxu1 %v2654_v29 }
 0x136   : > { %2286 = vmatmul.mubr.f32.gmra.mrb[42].mxu1 %v697_v1 }
 0x137   : > { %2288 = vmatprep.mubr.f32.mxu1 %v698_v63  ;;  %2657 = vmatpush3.bf16.msra.mxu1 %v2654_v29 }
 0x138   : > { %2659 = vmatprep.subr.bf16.mxu1 %v2658_v32 }
 0x13a   : > { %2289 = vmatmul.mubr.f32.gmra.mrb[44].mxu1 %v699_v4 }
 0x13b   : > { %2291 = vmatprep.mubr.f32.mxu1 %v700_v3  ;;  %2661 = vmatpush3.bf16.msra.mxu1 %v2658_v32 }
 0x13e   : > { %2292 = vmatmul.mubr.f32.gmra.mrb[46].mxu1 %v701_v6 }
 0x1d5   : > { %v2248_v34 = vpop.f32.mrb[16].mxu1 }
 0x1d6   : > { %v797_v35 = vadd.f32 %v2248_v34, %v3089_v33  ;;  %v791_v36 = vpop.f32.mrb[17].mxu1 }
 0x1d7   : > { %v792_v38 = vadd.f32 %v3089_v33, %v791_v36 }
 0x1d8   : > { %v951_v42 = vmax.f32 %v797_v35, 0.0 }
 0x1d9   : > { %v950_v39 = vmax.f32 %v792_v38, 0.0  ;;  %v2251_v40 = vpop.f32.mrb[18].mxu1 }
 0x1da   : > { %v807_v44 = vadd.f32 %v2251_v40, %v3089_v33  ;;  %v801_v43 = vpop.f32.mrb[19].mxu1 }
 0x1db   : > { %v802_v45 = vadd.f32 %v3089_v33, %v801_v43  ;;  %2326 = vmatprep.mubr.f32.mxu0 %v950_v39 }
 0x1dc   : > { %2327 = vmatmul.mubr.f32.vlgmr.msra.gmra.mrb[16].mxu0 %v951_v42  ;;  %v953_v48 = vmax.f32 %v807_v44, 0.0 }
 0x1dd   : > { %v952_v46 = vmax.f32 %v802_v45, 0.0  ;;  %v2254_v47 = vpop.f32.mrb[20].mxu1 }
 0x1de   : > { %v817_v50 = vadd.f32 %v2254_v47, %v3089_v33  ;;  %v811_v51 = vpop.f32.mrb[21].mxu1 }
 0x1df   : > { %v812_v52 = vadd.f32 %v3089_v33, %v811_v51  ;;  %2329 = vmatprep.mubr.f32.mxu0 %v952_v46 }
 0x1e0   : > { %2330 = vmatmul.mubr.f32.gmra.mrb[18].mxu0 %v953_v48  ;;  %v955_v54 = vmax.f32 %v817_v50, 0.0 }
 0x1e1   : > { %v954_v41 = vmax.f32 %v812_v52, 0.0  ;;  %v2257_v53 = vpop.f32.mrb[22].mxu1 }
 0x1e2   : > { %v827_v55 = vadd.f32 %v2257_v53, %v3089_v33  ;;  %v821_v49 = vpop.f32.mrb[23].mxu1 }
 0x1e3   : > { %v822_v56 = vadd.f32 %v3089_v33, %v821_v49  ;;  %2332 = vmatprep.mubr.f32.mxu0 %v954_v41 }
 0x1e4   : > { %2333 = vmatmul.mubr.f32.gmra.mrb[20].mxu0 %v955_v54  ;;  %v957_v57 = vmax.f32 %v827_v55, 0.0 }
 0x1e5   : > { %v956_v58 = vmax.f32 %v822_v56, 0.0  ;;  %v2260_v59 = vpop.f32.mrb[24].mxu1 }
 0x1e6   : > { %v837_v60 = vadd.f32 %v2260_v59, %v3089_v33  ;;  %v831_v61 = vpop.f32.mrb[25].mxu1 }
 0x1e7   : > { %v832_v62 = vadd.f32 %v3089_v33, %v831_v61  ;;  %2335 = vmatprep.mubr.f32.mxu0 %v956_v58 }
 0x1e8   : > { %2336 = vmatmul.mubr.f32.gmra.mrb[22].mxu0 %v957_v57  ;;  %v959_v1 = vmax.f32 %v837_v60, 0.0 }
 0x1e9   : > { %v958_v63 = vmax.f32 %v832_v62, 0.0  ;;  %v2263_v0 = vpop.f32.mrb[26].mxu1 }
 0x1ea   : > { %v847_v2 = vadd.f32 %v2263_v0, %v3089_v33  ;;  %v841_v3 = vpop.f32.mrb[27].mxu1 }
 0x1eb   : > { %v842_v4 = vadd.f32 %v3089_v33, %v841_v3  ;;  %2338 = vmatprep.mubr.f32.mxu0 %v958_v63 }
 0x1ec   : > { %2339 = vmatmul.mubr.f32.gmra.mrb[24].mxu0 %v959_v1  ;;  %v961_v7 = vmax.f32 %v847_v2, 0.0 }
 0x1ed   : > { %v960_v5 = vmax.f32 %v842_v4, 0.0  ;;  %v2266_v6 = vpop.f32.mrb[28].mxu1  ;;  %v1542_v4 = vld [vmem:[%s3333_s9] sm:$0xff] }
 0x1ee   : > { %v857_v8 = vadd.f32 %v2266_v6, %v3089_v33  ;;  %v851_v9 = vpop.f32.mrb[29].mxu1  ;;  %v1544_v6 = vld [vmem:[%s3333_s9 + $0x10] sm:$0xff] }
 0x1ef   : > { %v852_v10 = vadd.f32 %v3089_v33, %v851_v9  ;;  %2341 = vmatprep.mubr.f32.mxu0 %v960_v5  ;;  %v1543_v5 = vld [vmem:[%s3333_s9 + $0x8] sm:$0xff]  ;;  %v1546_v9 = vld [vmem:[%s3333_s9 + $0x20] sm:$0xff] }
 0x1f0   : > { %2342 = vmatmul.mubr.f32.gmra.mrb[26].mxu0 %v961_v7  ;;  %v963_v12 = vmax.f32 %v857_v8, 0.0  ;;  %v2662_v7 = vpack.c.bf16 %v1543_v5, %v1542_v4 }
 0x1f1   : > { %v962_v37 = vmax.f32 %v852_v10, 0.0  ;;  %v2269_v11 = vpop.f32.mrb[30].mxu1  ;;  %v1547_v10 = vld [vmem:[%s3333_s9 + $0x28] sm:$0xff] }
 0x1f2   : > { %v867_v13 = vadd.f32 %v2269_v11, %v3089_v33  ;;  %v861_v14 = vpop.f32.mrb[31].mxu1  ;;  %2663 = vmatprep.subr.bf16.mxu0 %v2662_v7  ;;  %v1548_v11 = vld [vmem:[%s3333_s9 + $0x30] sm:$0xff] }
 0x1f3   : > { %v862_v15 = vadd.f32 %v3089_v33, %v861_v14  ;;  %2344 = vmatprep.mubr.f32.mxu0 %v962_v37  ;;  %2665 = vmatpush3.bf16.msra.mxu0 %v2662_v7  ;;  %v2670_v37 = vpack.c.bf16 %v1547_v10, %v1546_v9  ;;  %v1550_v14 = vld [vmem:[%s3333_s9 + $0x40] sm:$0xff] }
 0x1f4   : > { %2345 = vmatmul.mubr.f32.gmra.mrb[28].mxu0 %v963_v12  ;;  %v965_v18 = vmax.f32 %v867_v13, 0.0  ;;  %v1549_v12 = vld [vmem:[%s3333_s9 + $0x38] sm:$0xff] }
 0x1f5   : > { %v964_v16 = vmax.f32 %v862_v15, 0.0  ;;  %v2272_v17 = vpop.f32.mrb[32].mxu1  ;;  %v2674_v13 = vpack.c.bf16 %v1549_v12, %v1548_v11  ;;  %v1551_v15 = vld [vmem:[%s3333_s9 + $0x48] sm:$0xff] }
 0x1f6   : > { %v877_v19 = vadd.f32 %v2272_v17, %v3089_v33  ;;  %v871_v20 = vpop.f32.mrb[33].mxu1  ;;  %v1552_v17 = vld [vmem:[%s3333_s9 + $0x50] sm:$0xff] }
 0x1f7   : > { %v872_v21 = vadd.f32 %v3089_v33, %v871_v20  ;;  %2347 = vmatprep.mubr.f32.mxu0 %v964_v16  ;;  %v2678_v16 = vpack.c.bf16 %v1551_v15, %v1550_v14  ;;  %v1554_v20 = vld [vmem:[%s3333_s9 + $0x60] sm:$0xff] }
 0x1f8   : > { %2348 = vmatmul.mubr.f32.gmra.mrb[30].mxu0 %v965_v18  ;;  %v967_v24 = vmax.f32 %v877_v19, 0.0  ;;  %v1553_v18 = vld [vmem:[%s3333_s9 + $0x58] sm:$0xff] }
 0x1f9   : > { %v966_v22 = vmax.f32 %v872_v21, 0.0  ;;  %v2275_v23 = vpop.f32.mrb[34].mxu1  ;;  %v2682_v19 = vpack.c.bf16 %v1553_v18, %v1552_v17  ;;  %v1555_v21 = vld [vmem:[%s3333_s9 + $0x68] sm:$0xff] }
 0x1fa   : > { %v887_v25 = vadd.f32 %v2275_v23, %v3089_v33  ;;  %v881_v26 = vpop.f32.mrb[35].mxu1  ;;  %v1556_v23 = vld [vmem:[%s3333_s9 + $0x70] sm:$0xff] }
 0x1fb   : > { %v882_v27 = vadd.f32 %v3089_v33, %v881_v26  ;;  %2350 = vmatprep.mubr.f32.mxu0 %v966_v22  ;;  %v2686_v22 = vpack.c.bf16 %v1555_v21, %v1554_v20  ;;  %v3174_v26 = vld [vmem:[%s3330_s6] ss:$0 sm:$0xff] }
 0x1fc   : > { %2351 = vmatmul.mubr.f32.gmra.mrb[32].mxu0 %v967_v24  ;;  %v969_v30 = vmax.f32 %v887_v25, 0.0  ;;  %v1557_v24 = vld [vmem:[%s3333_s9 + $0x78] sm:$0xff] }
 0x1fd   : > { %v968_v28 = vmax.f32 %v882_v27, 0.0  ;;  %v2278_v29 = vpop.f32.mrb[36].mxu1  ;;  %v2690_v25 = vpack.c.bf16 %v1557_v24, %v1556_v23 }
 0x1fe   : > { %v897_v31 = vadd.f32 %v2278_v29, %v3089_v33  ;;  %v891_v32 = vpop.f32.mrb[37].mxu1 }
 0x1ff   : > { %v892_v34 = vadd.f32 %v3089_v33, %v891_v32  ;;  %2353 = vmatprep.mubr.f32.mxu0 %v968_v28 }
 0x200   : > { %2354 = vmatmul.mubr.f32.gmra.mrb[34].mxu0 %v969_v30  ;;  %v971_v38 = vmax.f32 %v897_v31, 0.0 }
 0x201   : > { %v970_v35 = vmax.f32 %v892_v34, 0.0  ;;  %v2281_v36 = vpop.f32.mrb[38].mxu1 }
 0x202   : > { %v907_v39 = vadd.f32 %v2281_v36, %v3089_v33  ;;  %v901_v40 = vpop.f32.mrb[39].mxu1 }
 0x203   : > { %v902_v42 = vadd.f32 %v3089_v33, %v901_v40  ;;  %2356 = vmatprep.mubr.f32.mxu0 %v970_v35 }
 0x204   : > { %2357 = vmatmul.mubr.f32.gmra.mrb[36].mxu0 %v971_v38  ;;  %v973_v45 = vmax.f32 %v907_v39, 0.0 }
 0x205   : > { %v972_v44 = vmax.f32 %v902_v42, 0.0  ;;  %v2284_v43 = vpop.f32.mrb[40].mxu1 }
 0x206   : > { %v917_v46 = vadd.f32 %v2284_v43, %v3089_v33  ;;  %v911_v47 = vpop.f32.mrb[41].mxu1 }
 0x207   : > { %v912_v48 = vadd.f32 %v3089_v33, %v911_v47  ;;  %2359 = vmatprep.mubr.f32.mxu0 %v972_v44 }
 0x208   : > { %2360 = vmatmul.mubr.f32.gmra.mrb[38].mxu0 %v973_v45  ;;  %v975_v52 = vmax.f32 %v917_v46, 0.0 }
 0x209   : > { %v974_v50 = vmax.f32 %v912_v48, 0.0  ;;  %v2287_v51 = vpop.f32.mrb[42].mxu1 }
 0x20a   : > { %v927_v41 = vadd.f32 %v2287_v51, %v3089_v33  ;;  %v921_v53 = vpop.f32.mrb[43].mxu1 }
 0x20b   : > { %v922_v54 = vadd.f32 %v3089_v33, %v921_v53  ;;  %2362 = vmatprep.mubr.f32.mxu0 %v974_v50 }
 0x20c   : > { %2363 = vmatmul.mubr.f32.gmra.mrb[40].mxu0 %v975_v52  ;;  %v977_v56 = vmax.f32 %v927_v41, 0.0 }
 0x20d   : > { %v976_v55 = vmax.f32 %v922_v54, 0.0  ;;  %v2290_v49 = vpop.f32.mrb[44].mxu1 }
 0x20e   : > { %v937_v58 = vadd.f32 %v2290_v49, %v3089_v33  ;;  %v931_v59 = vpop.f32.mrb[45].mxu1 }
 0x20f   : > { %v932_v57 = vadd.f32 %v3089_v33, %v931_v59  ;;  %2365 = vmatprep.mubr.f32.mxu0 %v976_v55 }
 0x210   : > { %2366 = vmatmul.mubr.f32.gmra.mrb[42].mxu0 %v977_v56  ;;  %v979_v62 = vmax.f32 %v937_v58, 0.0 }
 0x211   : > { %v978_v60 = vmax.f32 %v932_v57, 0.0  ;;  %v2293_v61 = vpop.f32.mrb[46].mxu1 }
 0x212   : > { %v947_v63 = vadd.f32 %v2293_v61, %v3089_v33  ;;  %v941_v0 = vpop.f32.mrb[47].mxu1 }
 0x213   : > { %v942_v1 = vadd.f32 %v3089_v33, %v941_v0  ;;  %2368 = vmatprep.mubr.f32.mxu0 %v978_v60  ;;  %v1545_v33 = vld [vmem:[%s3333_s9 + $0x18] sm:$0xff] }
 0x214   : > { %2369 = vmatmul.mubr.f32.gmra.mrb[44].mxu0 %v979_v62  ;;  %v981_v3 = vmax.f32 %v947_v63, 0.0  ;;  %v2666_v8 = vpack.c.bf16 %v1545_v33, %v1544_v6 }
 0x215   : > { %v980_v2 = vmax.f32 %v942_v1, 0.0 }
 0x216   : > { %2667 = vmatprep.subr.bf16.mxu0 %v2666_v8 }
 0x217   : > { %2371 = vmatprep.mubr.f32.mxu0 %v980_v2  ;;  %2669 = vmatpush3.bf16.msra.mxu0 %v2666_v8 }
 0x218   : > { %2372 = vmatmul.mubr.f32.gmra.mrb[46].mxu0 %v981_v3  ;;  %2671 = vmatprep.subr.bf16.mxu0 %v2670_v37 }
 0x21b   : > { %2673 = vmatpush3.bf16.msra.mxu0 %v2670_v37 }
 0x21c   : > { %2675 = vmatprep.subr.bf16.mxu0 %v2674_v13 }
 0x21f   : > { %2677 = vmatpush3.bf16.msra.mxu0 %v2674_v13 }
 0x220   : > { %2679 = vmatprep.subr.bf16.mxu0 %v2678_v16 }
 0x223   : > { %2681 = vmatpush3.bf16.msra.mxu0 %v2678_v16 }
 0x224   : > { %2683 = vmatprep.subr.bf16.mxu0 %v2682_v19 }
 0x227   : > { %2685 = vmatpush3.bf16.msra.mxu0 %v2682_v19 }
 0x228   : > { %2687 = vmatprep.subr.bf16.mxu0 %v2686_v22 }
 0x22b   : > { %2689 = vmatpush3.bf16.msra.mxu0 %v2686_v22 }
 0x22c   : > { %2691 = vmatprep.subr.bf16.mxu0 %v2690_v25 }
 0x22f   : > { %2693 = vmatpush3.bf16.msra.mxu0 %v2690_v25 }
 0x2af   : > { %v2328_v27 = vpop.f32.mrb[16].mxu0 }
 0x2b0   : > { %v1077_v28 = vadd.f32 %v2328_v27, %v3174_v26  ;;  %v1071_v29 = vpop.f32.mrb[17].mxu0 }
 0x2b1   : > { %v1072_v30 = vadd.f32 %v3174_v26, %v1071_v29 }
 0x2b2   : > { %v1231_v34 = vmax.f32 %v1077_v28, 0.0 }
 0x2b3   : > { %v1230_v31 = vmax.f32 %v1072_v30, 0.0  ;;  %v2331_v32 = vpop.f32.mrb[18].mxu0 }
 0x2b4   : > { %v1087_v35 = vadd.f32 %v2331_v32, %v3174_v26  ;;  %v1081_v36 = vpop.f32.mrb[19].mxu0 }
 0x2b5   : > { %v1082_v38 = vadd.f32 %v3174_v26, %v1081_v36  ;;  %2406 = vmatprep.mubr.f32.mxu1 %v1230_v31 }
 0x2b6   : > { %2407 = vmatmul.mubr.f32.vlgmr.msra.gmra.mrb[48].mxu1 %v1231_v34  ;;  %v1233_v42 = vmax.f32 %v1087_v35, 0.0 }
 0x2b7   : > { %v1232_v39 = vmax.f32 %v1082_v38, 0.0  ;;  %v2334_v40 = vpop.f32.mrb[20].mxu0 }
 0x2b8   : > { %v1097_v44 = vadd.f32 %v2334_v40, %v3174_v26  ;;  %v1091_v43 = vpop.f32.mrb[21].mxu0 }
 0x2b9   : > { %v1092_v45 = vadd.f32 %v3174_v26, %v1091_v43  ;;  %2409 = vmatprep.mubr.f32.mxu1 %v1232_v39 }
 0x2ba   : > { %2410 = vmatmul.mubr.f32.gmra.mrb[50].mxu1 %v1233_v42  ;;  %v1235_v48 = vmax.f32 %v1097_v44, 0.0 }
 0x2bb   : > { %v1234_v46 = vmax.f32 %v1092_v45, 0.0  ;;  %v2337_v47 = vpop.f32.mrb[22].mxu0 }
 0x2bc   : > { %v1107_v50 = vadd.f32 %v2337_v47, %v3174_v26  ;;  %v1101_v51 = vpop.f32.mrb[23].mxu0 }
 0x2bd   : > { %v1102_v52 = vadd.f32 %v3174_v26, %v1101_v51  ;;  %2412 = vmatprep.mubr.f32.mxu1 %v1234_v46 }
 0x2be   : > { %2413 = vmatmul.mubr.f32.gmra.mrb[52].mxu1 %v1235_v48  ;;  %v1237_v54 = vmax.f32 %v1107_v50, 0.0 }
 0x2bf   : > { %v1236_v41 = vmax.f32 %v1102_v52, 0.0  ;;  %v2340_v53 = vpop.f32.mrb[24].mxu0 }
 0x2c0   : > { %v1117_v55 = vadd.f32 %v2340_v53, %v3174_v26  ;;  %v1111_v49 = vpop.f32.mrb[25].mxu0 }
 0x2c1   : > { %v1112_v56 = vadd.f32 %v3174_v26, %v1111_v49  ;;  %2415 = vmatprep.mubr.f32.mxu1 %v1236_v41 }
 0x2c2   : > { %2416 = vmatmul.mubr.f32.gmra.mrb[54].mxu1 %v1237_v54  ;;  %v1239_v57 = vmax.f32 %v1117_v55, 0.0 }
 0x2c3   : > { %v1238_v58 = vmax.f32 %v1112_v56, 0.0  ;;  %v2343_v59 = vpop.f32.mrb[26].mxu0 }
 0x2c4   : > { %v1127_v60 = vadd.f32 %v2343_v59, %v3174_v26  ;;  %v1121_v61 = vpop.f32.mrb[27].mxu0 }
 0x2c5   : > { %v1122_v62 = vadd.f32 %v3174_v26, %v1121_v61  ;;  %2418 = vmatprep.mubr.f32.mxu1 %v1238_v58 }
 0x2c6   : > { %2419 = vmatmul.mubr.f32.gmra.mrb[56].mxu1 %v1239_v57  ;;  %v1241_v1 = vmax.f32 %v1127_v60, 0.0 }
 0x2c7   : > { %v1240_v63 = vmax.f32 %v1122_v62, 0.0  ;;  %v2346_v0 = vpop.f32.mrb[28].mxu0  ;;  %v3211_v62 = vld [vmem:[%s3332_s8] ss:$0 sm:$0xff] }
 0x2c8   : > { %v1137_v2 = vadd.f32 %v2346_v0, %v3174_v26  ;;  %v1131_v3 = vpop.f32.mrb[29].mxu0 }
 0x2c9   : > { %v1132_v4 = vadd.f32 %v3174_v26, %v1131_v3  ;;  %2421 = vmatprep.mubr.f32.mxu1 %v1240_v63 }
 0x2ca   : > { %2422 = vmatmul.mubr.f32.gmra.mrb[58].mxu1 %v1241_v1  ;;  %v1243_v7 = vmax.f32 %v1137_v2, 0.0 }
 0x2cb   : > { %v1242_v5 = vmax.f32 %v1132_v4, 0.0  ;;  %v2349_v6 = vpop.f32.mrb[30].mxu0 }
 0x2cc   : > { %v1147_v33 = vadd.f32 %v2349_v6, %v3174_v26  ;;  %v1141_v8 = vpop.f32.mrb[31].mxu0 }
 0x2cd   : > { %v1142_v9 = vadd.f32 %v3174_v26, %v1141_v8  ;;  %2424 = vmatprep.mubr.f32.mxu1 %v1242_v5 }
 0x2ce   : > { %2425 = vmatmul.mubr.f32.gmra.mrb[60].mxu1 %v1243_v7  ;;  %v1245_v11 = vmax.f32 %v1147_v33, 0.0 }
 0x2cf   : > { %v1244_v10 = vmax.f32 %v1142_v9, 0.0  ;;  %v2352_v37 = vpop.f32.mrb[32].mxu0 }
 0x2d0   : > { %v1157_v12 = vadd.f32 %v2352_v37, %v3174_v26  ;;  %v1151_v13 = vpop.f32.mrb[33].mxu0 }
 0x2d1   : > { %v1152_v14 = vadd.f32 %v3174_v26, %v1151_v13  ;;  %2427 = vmatprep.mubr.f32.mxu1 %v1244_v10 }
 0x2d2   : > { %2428 = vmatmul.mubr.f32.gmra.mrb[62].mxu1 %v1245_v11  ;;  %v1247_v17 = vmax.f32 %v1157_v12, 0.0 }
 0x2d3   : > { %v1246_v15 = vmax.f32 %v1152_v14, 0.0  ;;  %v2355_v16 = vpop.f32.mrb[34].mxu0 }
 0x2d4   : > { %v1167_v18 = vadd.f32 %v2355_v16, %v3174_v26  ;;  %v1161_v19 = vpop.f32.mrb[35].mxu0 }
 0x2d5   : > { %v1162_v20 = vadd.f32 %v3174_v26, %v1161_v19  ;;  %2430 = vmatprep.mubr.f32.mxu1 %v1246_v15 }
 0x2d6   : > { %2431 = vmatmul.mubr.f32.gmra.mrb[64].mxu1 %v1247_v17  ;;  %v1249_v23 = vmax.f32 %v1167_v18, 0.0 }
 0x2d7   : > { %v1248_v21 = vmax.f32 %v1162_v20, 0.0  ;;  %v2358_v22 = vpop.f32.mrb[36].mxu0 }
 0x2d8   : > { %v1177_v24 = vadd.f32 %v2358_v22, %v3174_v26  ;;  %v1171_v25 = vpop.f32.mrb[37].mxu0 }
 0x2d9   : > { %v1172_v27 = vadd.f32 %v3174_v26, %v1171_v25  ;;  %2433 = vmatprep.mubr.f32.mxu1 %v1248_v21 }
 0x2da   : > { %2434 = vmatmul.mubr.f32.gmra.mrb[66].mxu1 %v1249_v23  ;;  %v1251_v30 = vmax.f32 %v1177_v24, 0.0 }
 0x2db   : > { %v1250_v28 = vmax.f32 %v1172_v27, 0.0  ;;  %v2361_v29 = vpop.f32.mrb[38].mxu0 }
 0x2dc   : > { %v1187_v31 = vadd.f32 %v2361_v29, %v3174_v26  ;;  %v1181_v32 = vpop.f32.mrb[39].mxu0 }
 0x2dd   : > { %v1182_v34 = vadd.f32 %v3174_v26, %v1181_v32  ;;  %2436 = vmatprep.mubr.f32.mxu1 %v1250_v28 }
 0x2de   : > { %2437 = vmatmul.mubr.f32.gmra.mrb[68].mxu1 %v1251_v30  ;;  %v1253_v38 = vmax.f32 %v1187_v31, 0.0 }
 0x2df   : > { %v1252_v35 = vmax.f32 %v1182_v34, 0.0  ;;  %v2364_v36 = vpop.f32.mrb[40].mxu0 }
 0x2e0   : > { %v1197_v39 = vadd.f32 %v2364_v36, %v3174_v26  ;;  %v1191_v40 = vpop.f32.mrb[41].mxu0 }
 0x2e1   : > { %v1192_v42 = vadd.f32 %v3174_v26, %v1191_v40  ;;  %2439 = vmatprep.mubr.f32.mxu1 %v1252_v35 }
 0x2e2   : > { %2440 = vmatmul.mubr.f32.gmra.mrb[70].mxu1 %v1253_v38  ;;  %v1255_v45 = vmax.f32 %v1197_v39, 0.0 }
 0x2e3   : > { %v1254_v44 = vmax.f32 %v1192_v42, 0.0  ;;  %v2367_v43 = vpop.f32.mrb[42].mxu0 }
 0x2e4   : > { %v1207_v46 = vadd.f32 %v2367_v43, %v3174_v26  ;;  %v1201_v47 = vpop.f32.mrb[43].mxu0 }
 0x2e5   : > { %v1202_v48 = vadd.f32 %v3174_v26, %v1201_v47  ;;  %2442 = vmatprep.mubr.f32.mxu1 %v1254_v44 }
 0x2e6   : > { %2443 = vmatmul.mubr.f32.gmra.mrb[72].mxu1 %v1255_v45  ;;  %v1257_v52 = vmax.f32 %v1207_v46, 0.0 }
 0x2e7   : > { %v1256_v50 = vmax.f32 %v1202_v48, 0.0  ;;  %v2370_v51 = vpop.f32.mrb[44].mxu0 }
 0x2e8   : > { %v1217_v41 = vadd.f32 %v2370_v51, %v3174_v26  ;;  %v1211_v53 = vpop.f32.mrb[45].mxu0 }
 0x2e9   : > { %v1212_v54 = vadd.f32 %v3174_v26, %v1211_v53  ;;  %2445 = vmatprep.mubr.f32.mxu1 %v1256_v50 }
 0x2ea   : > { %2446 = vmatmul.mubr.f32.gmra.mrb[74].mxu1 %v1257_v52  ;;  %v1259_v56 = vmax.f32 %v1217_v41, 0.0 }
 0x2eb   : > { %v1258_v55 = vmax.f32 %v1212_v54, 0.0  ;;  %v2373_v49 = vpop.f32.mrb[46].mxu0 }
 0x2ec   : > { %v1227_v58 = vadd.f32 %v2373_v49, %v3174_v26  ;;  %v1221_v59 = vpop.f32.mrb[47].mxu0 }
 0x2ed   : > { %v1222_v57 = vadd.f32 %v3174_v26, %v1221_v59  ;;  %2448 = vmatprep.mubr.f32.mxu1 %v1258_v55 }
 0x2ee   : > { %2449 = vmatmul.mubr.f32.gmra.mrb[76].mxu1 %v1259_v56  ;;  %v1261_v61 = vmax.f32 %v1227_v58, 0.0 }
 0x2ef   : > { %v1260_v60 = vmax.f32 %v1222_v57, 0.0 }
 0x2f1   : > { %2451 = vmatprep.mubr.f32.mxu1 %v1260_v60 }
 0x2f2   : > { %2452 = vmatmul.mubr.f32.gmra.mrb[78].mxu1 %v1261_v61 }
 0x389   : > { %v2408_v63 = vpop.f32.mrb[48].mxu1 }
 0x38a   : > { %v1357_v0 = vadd.f32 %v2408_v63, %v3211_v62  ;;  %v1351_v1 = vpop.f32.mrb[49].mxu1 }
 0x38b   : > { %v1352_v2 = vadd.f32 %v3211_v62, %v1351_v1 }
 0x38c   : > { %v1511_v26 = vmax.f32 %v1357_v0, 0.0 }
 0x38d   : > { %v1510_v3 = vmax.f32 %v1352_v2, 0.0  ;;  %v2411_v4 = vpop.f32.mrb[50].mxu1 }
 0x38e   : > { %v1367_v5 = vadd.f32 %v2411_v4, %v3211_v62  ;;  %v1361_v6 = vpop.f32.mrb[51].mxu1 }
 0x38f   : > { %v1362_v7 = vadd.f32 %v3211_v62, %v1361_v6  ;;  %2486 = vmatprep.mubr.f32.mxu0 %v1510_v3 }
 0x390   : > { %2487 = vmatmul.mubr.f32.vlgmr.msra.gmra.mrb[48].mxu0 %v1511_v26  ;;  %v1513_v9 = vmax.f32 %v1367_v5, 0.0 }
 0x391   : > { %v1512_v33 = vmax.f32 %v1362_v7, 0.0  ;;  %v2414_v8 = vpop.f32.mrb[52].mxu1 }
 0x392   : > { %v1377_v10 = vadd.f32 %v2414_v8, %v3211_v62  ;;  %v1371_v37 = vpop.f32.mrb[53].mxu1 }
 0x393   : > { %v1372_v11 = vadd.f32 %v3211_v62, %v1371_v37  ;;  %2489 = vmatprep.mubr.f32.mxu0 %v1512_v33 }
 0x394   : > { %2490 = vmatmul.mubr.f32.gmra.mrb[50].mxu0 %v1513_v9  ;;  %v1515_v14 = vmax.f32 %v1377_v10, 0.0 }
 0x395   : > { %v1514_v12 = vmax.f32 %v1372_v11, 0.0  ;;  %v2417_v13 = vpop.f32.mrb[54].mxu1 }
 0x396   : > { %v1387_v15 = vadd.f32 %v2417_v13, %v3211_v62  ;;  %v1381_v16 = vpop.f32.mrb[55].mxu1 }
 0x397   : > { %v1382_v17 = vadd.f32 %v3211_v62, %v1381_v16  ;;  %2492 = vmatprep.mubr.f32.mxu0 %v1514_v12 }
 0x398   : > { %2493 = vmatmul.mubr.f32.gmra.mrb[52].mxu0 %v1515_v14  ;;  %v1517_v20 = vmax.f32 %v1387_v15, 0.0 }
 0x399   : > { %v1516_v18 = vmax.f32 %v1382_v17, 0.0  ;;  %v2420_v19 = vpop.f32.mrb[56].mxu1 }
 0x39a   : > { %v1397_v21 = vadd.f32 %v2420_v19, %v3211_v62  ;;  %v1391_v22 = vpop.f32.mrb[57].mxu1 }
 0x39b   : > { %v1392_v23 = vadd.f32 %v3211_v62, %v1391_v22  ;;  %2495 = vmatprep.mubr.f32.mxu0 %v1516_v18 }
 0x39c   : > { %2496 = vmatmul.mubr.f32.gmra.mrb[54].mxu0 %v1517_v20  ;;  %v1519_v27 = vmax.f32 %v1397_v21, 0.0 }
 0x39d   : > { %v1518_v24 = vmax.f32 %v1392_v23, 0.0  ;;  %v2423_v25 = vpop.f32.mrb[58].mxu1 }
 0x39e   : > { %v1407_v28 = vadd.f32 %v2423_v25, %v3211_v62  ;;  %v1401_v29 = vpop.f32.mrb[59].mxu1 }
 0x39f   : > { %v1402_v30 = vadd.f32 %v3211_v62, %v1401_v29  ;;  %2498 = vmatprep.mubr.f32.mxu0 %v1518_v24 }
 0x3a0   : > { %2499 = vmatmul.mubr.f32.gmra.mrb[56].mxu0 %v1519_v27  ;;  %v1521_v34 = vmax.f32 %v1407_v28, 0.0 }
 0x3a1   : > { %v1520_v31 = vmax.f32 %v1402_v30, 0.0  ;;  %v2426_v32 = vpop.f32.mrb[60].mxu1  ;;  %v3248_v30 = vld [vmem:[%s3334_s10] ss:$0 sm:$0xff] }
 0x3a2   : > { %v1417_v35 = vadd.f32 %v2426_v32, %v3211_v62  ;;  %v1411_v36 = vpop.f32.mrb[61].mxu1 }
 0x3a3   : > { %v1412_v38 = vadd.f32 %v3211_v62, %v1411_v36  ;;  %2501 = vmatprep.mubr.f32.mxu0 %v1520_v31 }
 0x3a4   : > { %2502 = vmatmul.mubr.f32.gmra.mrb[58].mxu0 %v1521_v34  ;;  %v1523_v42 = vmax.f32 %v1417_v35, 0.0 }
 0x3a5   : > { %v1522_v39 = vmax.f32 %v1412_v38, 0.0  ;;  %v2429_v40 = vpop.f32.mrb[62].mxu1 }
 0x3a6   : > { %v1427_v44 = vadd.f32 %v2429_v40, %v3211_v62  ;;  %v1421_v43 = vpop.f32.mrb[63].mxu1 }
 0x3a7   : > { %v1422_v45 = vadd.f32 %v3211_v62, %v1421_v43  ;;  %2504 = vmatprep.mubr.f32.mxu0 %v1522_v39 }
 0x3a8   : > { %2505 = vmatmul.mubr.f32.gmra.mrb[60].mxu0 %v1523_v42  ;;  %v1525_v48 = vmax.f32 %v1427_v44, 0.0 }
 0x3a9   : > { %v1524_v46 = vmax.f32 %v1422_v45, 0.0  ;;  %v2432_v47 = vpop.f32.mrb[64].mxu1 }
 0x3aa   : > { %v1437_v50 = vadd.f32 %v2432_v47, %v3211_v62  ;;  %v1431_v51 = vpop.f32.mrb[65].mxu1 }
 0x3ab   : > { %v1432_v52 = vadd.f32 %v3211_v62, %v1431_v51  ;;  %2507 = vmatprep.mubr.f32.mxu0 %v1524_v46 }
 0x3ac   : > { %2508 = vmatmul.mubr.f32.gmra.mrb[62].mxu0 %v1525_v48  ;;  %v1527_v54 = vmax.f32 %v1437_v50, 0.0 }
 0x3ad   : > { %v1526_v41 = vmax.f32 %v1432_v52, 0.0  ;;  %v2435_v53 = vpop.f32.mrb[66].mxu1 }
 0x3ae   : > { %v1447_v55 = vadd.f32 %v2435_v53, %v3211_v62  ;;  %v1441_v49 = vpop.f32.mrb[67].mxu1 }
 0x3af   : > { %v1442_v56 = vadd.f32 %v3211_v62, %v1441_v49  ;;  %2510 = vmatprep.mubr.f32.mxu0 %v1526_v41 }
 0x3b0   : > { %2511 = vmatmul.mubr.f32.gmra.mrb[64].mxu0 %v1527_v54  ;;  %v1529_v57 = vmax.f32 %v1447_v55, 0.0 }
 0x3b1   : > { %v1528_v58 = vmax.f32 %v1442_v56, 0.0  ;;  %v2438_v59 = vpop.f32.mrb[68].mxu1 }
 0x3b2   : > { %v1457_v60 = vadd.f32 %v2438_v59, %v3211_v62  ;;  %v1451_v61 = vpop.f32.mrb[69].mxu1 }
 0x3b3   : > { %v1452_v63 = vadd.f32 %v3211_v62, %v1451_v61  ;;  %2513 = vmatprep.mubr.f32.mxu0 %v1528_v58 }
 0x3b4   : > { %2514 = vmatmul.mubr.f32.gmra.mrb[66].mxu0 %v1529_v57  ;;  %v1531_v2 = vmax.f32 %v1457_v60, 0.0 }
 0x3b5   : > { %v1530_v0 = vmax.f32 %v1452_v63, 0.0  ;;  %v2441_v1 = vpop.f32.mrb[70].mxu1 }
 0x3b6   : > { %v1467_v3 = vadd.f32 %v2441_v1, %v3211_v62  ;;  %v1461_v4 = vpop.f32.mrb[71].mxu1 }
 0x3b7   : > { %v1462_v26 = vadd.f32 %v3211_v62, %v1461_v4  ;;  %2516 = vmatprep.mubr.f32.mxu0 %v1530_v0 }
 0x3b8   : > { %2517 = vmatmul.mubr.f32.gmra.mrb[68].mxu0 %v1531_v2  ;;  %v1533_v7 = vmax.f32 %v1467_v3, 0.0 }
 0x3b9   : > { %v1532_v5 = vmax.f32 %v1462_v26, 0.0  ;;  %v2444_v6 = vpop.f32.mrb[72].mxu1 }
 0x3ba   : > { %v1477_v33 = vadd.f32 %v2444_v6, %v3211_v62  ;;  %v1471_v8 = vpop.f32.mrb[73].mxu1 }
 0x3bb   : > { %v1472_v9 = vadd.f32 %v3211_v62, %v1471_v8  ;;  %2519 = vmatprep.mubr.f32.mxu0 %v1532_v5 }
 0x3bc   : > { %2520 = vmatmul.mubr.f32.gmra.mrb[70].mxu0 %v1533_v7  ;;  %v1535_v11 = vmax.f32 %v1477_v33, 0.0 }
 0x3bd   : > { %v1534_v10 = vmax.f32 %v1472_v9, 0.0  ;;  %v2447_v37 = vpop.f32.mrb[74].mxu1 }
 0x3be   : > { %v1487_v12 = vadd.f32 %v2447_v37, %v3211_v62  ;;  %v1481_v13 = vpop.f32.mrb[75].mxu1 }
 0x3bf   : > { %v1482_v14 = vadd.f32 %v3211_v62, %v1481_v13  ;;  %2522 = vmatprep.mubr.f32.mxu0 %v1534_v10 }
 0x3c0   : > { %2523 = vmatmul.mubr.f32.gmra.mrb[72].mxu0 %v1535_v11  ;;  %v1537_v17 = vmax.f32 %v1487_v12, 0.0 }
 0x3c1   : > { %v1536_v15 = vmax.f32 %v1482_v14, 0.0  ;;  %v2450_v16 = vpop.f32.mrb[76].mxu1 }
 0x3c2   : > { %v1497_v18 = vadd.f32 %v2450_v16, %v3211_v62  ;;  %v1491_v19 = vpop.f32.mrb[77].mxu1 }
 0x3c3   : > { %v1492_v20 = vadd.f32 %v3211_v62, %v1491_v19  ;;  %2525 = vmatprep.mubr.f32.mxu0 %v1536_v15 }
 0x3c4   : > { %2526 = vmatmul.mubr.f32.gmra.mrb[74].mxu0 %v1537_v17  ;;  %v1539_v23 = vmax.f32 %v1497_v18, 0.0 }
 0x3c5   : > { %v1538_v21 = vmax.f32 %v1492_v20, 0.0  ;;  %v2453_v22 = vpop.f32.mrb[78].mxu1 }
 0x3c6   : > { %v1507_v24 = vadd.f32 %v2453_v22, %v3211_v62  ;;  %v1501_v25 = vpop.f32.mrb[79].mxu1 }
 0x3c7   : > { %v1502_v27 = vadd.f32 %v3211_v62, %v1501_v25  ;;  %2528 = vmatprep.mubr.f32.mxu0 %v1538_v21 }
 0x3c8   : > { %2529 = vmatmul.mubr.f32.gmra.mrb[76].mxu0 %v1539_v23  ;;  %v1541_v29 = vmax.f32 %v1507_v24, 0.0 }
 0x3c9   : > { %v1540_v28 = vmax.f32 %v1502_v27, 0.0 }
 0x3cb   : > { %2531 = vmatprep.mubr.f32.mxu0 %v1540_v28 }
 0x3cc   : > { %2532 = vmatmul.mubr.f32.gmra.mrb[78].mxu0 %v1541_v29 }
 0x463   : > { %v2488_v62 = vpop.f32.mrb[48].mxu0 }
 0x464   : > { %v1637_v31 = vadd.f32 %v2488_v62, %v3248_v30  ;;  %v1631_v32 = vpop.f32.mrb[49].mxu0 }
 0x465   : > { %v1632_v34 = vadd.f32 %v3248_v30, %v1631_v32 }
 0x466   : > { %1791 = vst [vmem:[%s3255_s20 + $0x8] sm:$0xff] %v1637_v31 }
 0x467   : > { %1790 = vst [vmem:[%s3255_s20] sm:$0xff] %v1632_v34  ;;  %v2491_v35 = vpop.f32.mrb[50].mxu0 }
 0x468   : > { %v1647_v36 = vadd.f32 %v2491_v35, %v3248_v30  ;;  %v1641_v38 = vpop.f32.mrb[51].mxu0 }
 0x469   : > { %v1642_v39 = vadd.f32 %v3248_v30, %v1641_v38 }
 0x46a   : > { %1793 = vst [vmem:[%s3255_s20 + $0x18] sm:$0xff] %v1647_v36 }
 0x46b   : > { %1792 = vst [vmem:[%s3255_s20 + $0x10] sm:$0xff] %v1642_v39  ;;  %v2494_v40 = vpop.f32.mrb[52].mxu0 }
 0x46c   : > { %v1657_v42 = vadd.f32 %v2494_v40, %v3248_v30  ;;  %v1651_v44 = vpop.f32.mrb[53].mxu0 }
 0x46d   : > { %v1652_v43 = vadd.f32 %v3248_v30, %v1651_v44 }
 0x46e   : > { %1795 = vst [vmem:[%s3255_s20 + $0x28] sm:$0xff] %v1657_v42 }
 0x46f   : > { %1794 = vst [vmem:[%s3255_s20 + $0x20] sm:$0xff] %v1652_v43  ;;  %v2497_v45 = vpop.f32.mrb[54].mxu0 }
 0x470   : > { %v1667_v46 = vadd.f32 %v2497_v45, %v3248_v30  ;;  %v1661_v47 = vpop.f32.mrb[55].mxu0 }
 0x471   : > { %v1662_v48 = vadd.f32 %v3248_v30, %v1661_v47 }
 0x472   : > { %1797 = vst [vmem:[%s3255_s20 + $0x38] sm:$0xff] %v1667_v46 }
 0x473   : > { %1796 = vst [vmem:[%s3255_s20 + $0x30] sm:$0xff] %v1662_v48  ;;  %v2500_v50 = vpop.f32.mrb[56].mxu0 }
 0x474   : > { %v1677_v51 = vadd.f32 %v2500_v50, %v3248_v30  ;;  %v1671_v52 = vpop.f32.mrb[57].mxu0 }
 0x475   : > { %v1672_v41 = vadd.f32 %v3248_v30, %v1671_v52 }
 0x476   : > { %1799 = vst [vmem:[%s3255_s20 + $0x48] sm:$0xff] %v1677_v51 }
 0x477   : > { %1798 = vst [vmem:[%s3255_s20 + $0x40] sm:$0xff] %v1672_v41  ;;  %v2503_v53 = vpop.f32.mrb[58].mxu0 }
 0x478   : > { %v1687_v54 = vadd.f32 %v2503_v53, %v3248_v30  ;;  %v1681_v55 = vpop.f32.mrb[59].mxu0 }
 0x479   : > { %v1682_v49 = vadd.f32 %v3248_v30, %v1681_v55 }
 0x47a   : > { %1801 = vst [vmem:[%s3255_s20 + $0x58] sm:$0xff] %v1687_v54 }
 0x47b   : > { %1800 = vst [vmem:[%s3255_s20 + $0x50] sm:$0xff] %v1682_v49  ;;  %v2506_v56 = vpop.f32.mrb[60].mxu0 }
 0x47c   : > { %v1697_v58 = vadd.f32 %v2506_v56, %v3248_v30  ;;  %v1691_v59 = vpop.f32.mrb[61].mxu0 }
 0x47d   : > { %v1692_v57 = vadd.f32 %v3248_v30, %v1691_v59 }
 0x47e   : > { %1803 = vst [vmem:[%s3255_s20 + $0x68] sm:$0xff] %v1697_v58 }
 0x47f   : > { %1802 = vst [vmem:[%s3255_s20 + $0x60] sm:$0xff] %v1692_v57  ;;  %v2509_v60 = vpop.f32.mrb[62].mxu0 }
 0x480   : > { %v1707_v61 = vadd.f32 %v2509_v60, %v3248_v30  ;;  %v1701_v63 = vpop.f32.mrb[63].mxu0 }
 0x481   : > { %v1702_v0 = vadd.f32 %v3248_v30, %v1701_v63 }
 0x482   : > { %1805 = vst [vmem:[%s3255_s20 + $0x78] sm:$0xff] %v1707_v61 }
 0x483   : > { %1804 = vst [vmem:[%s3255_s20 + $0x70] sm:$0xff] %v1702_v0  ;;  %v2512_v1 = vpop.f32.mrb[64].mxu0 }
 0x484   : > { %v1717_v2 = vadd.f32 %v2512_v1, %v3248_v30  ;;  %v1711_v3 = vpop.f32.mrb[65].mxu0 }
 0x485   : > { %v1712_v4 = vadd.f32 %v3248_v30, %v1711_v3 }
 0x486   : > { %1807 = vst [vmem:[%s3255_s20 + $0x88] sm:$0xff] %v1717_v2 }
 0x487   : > { %1806 = vst [vmem:[%s3255_s20 + $0x80] sm:$0xff] %v1712_v4  ;;  %v2515_v26 = vpop.f32.mrb[66].mxu0 }
 0x488   : > { %v1727_v5 = vadd.f32 %v2515_v26, %v3248_v30  ;;  %v1721_v6 = vpop.f32.mrb[67].mxu0 }
 0x489   : > { %v1722_v7 = vadd.f32 %v3248_v30, %v1721_v6 }
 0x48a   : > { %1809 = vst [vmem:[%s3255_s20 + $0x98] sm:$0xff] %v1727_v5 }
 0x48b   : > { %1808 = vst [vmem:[%s3255_s20 + $0x90] sm:$0xff] %v1722_v7  ;;  %v2518_v33 = vpop.f32.mrb[68].mxu0 }
 0x48c   : > { %v1737_v8 = vadd.f32 %v2518_v33, %v3248_v30  ;;  %v1731_v9 = vpop.f32.mrb[69].mxu0 }
 0x48d   : > { %v1732_v10 = vadd.f32 %v3248_v30, %v1731_v9 }
 0x48e   : > { %1811 = vst [vmem:[%s3255_s20 + $0xa8] sm:$0xff] %v1737_v8 }
 0x48f   : > { %1810 = vst [vmem:[%s3255_s20 + $0xa0] sm:$0xff] %v1732_v10  ;;  %v2521_v37 = vpop.f32.mrb[70].mxu0 }
 0x490   : > { %v1747_v11 = vadd.f32 %v2521_v37, %v3248_v30  ;;  %v1741_v12 = vpop.f32.mrb[71].mxu0 }
 0x491   : > { %v1742_v13 = vadd.f32 %v3248_v30, %v1741_v12 }
 0x492   : > { %1813 = vst [vmem:[%s3255_s20 + $0xb8] sm:$0xff] %v1747_v11 }
 0x493   : > { %1812 = vst [vmem:[%s3255_s20 + $0xb0] sm:$0xff] %v1742_v13  ;;  %v2524_v14 = vpop.f32.mrb[72].mxu0 }
 0x494   : > { %v1757_v15 = vadd.f32 %v2524_v14, %v3248_v30  ;;  %v1751_v16 = vpop.f32.mrb[73].mxu0 }
 0x495   : > { %v1752_v17 = vadd.f32 %v3248_v30, %v1751_v16 }
 0x496   : > { %1815 = vst [vmem:[%s3255_s20 + $0xc8] sm:$0xff] %v1757_v15 }
 0x497   : > { %1814 = vst [vmem:[%s3255_s20 + $0xc0] sm:$0xff] %v1752_v17  ;;  %v2527_v18 = vpop.f32.mrb[74].mxu0 }
 0x498   : > { %v1767_v19 = vadd.f32 %v2527_v18, %v3248_v30  ;;  %v1761_v20 = vpop.f32.mrb[75].mxu0 }
 0x499   : > { %v1762_v21 = vadd.f32 %v3248_v30, %v1761_v20 }
 0x49a   : > { %1817 = vst [vmem:[%s3255_s20 + $0xd8] sm:$0xff] %v1767_v19 }
 0x49b   : > { %1816 = vst [vmem:[%s3255_s20 + $0xd0] sm:$0xff] %v1762_v21  ;;  %v2530_v22 = vpop.f32.mrb[76].mxu0 }
 0x49c   : > { %v1777_v23 = vadd.f32 %v2530_v22, %v3248_v30  ;;  %v1771_v24 = vpop.f32.mrb[77].mxu0 }
 0x49d   : > { %v1772_v25 = vadd.f32 %v3248_v30, %v1771_v24 }
 0x49e   : > { %1819 = vst [vmem:[%s3255_s20 + $0xe8] sm:$0xff] %v1777_v23 }
 0x49f   : > { %1818 = vst [vmem:[%s3255_s20 + $0xe0] sm:$0xff] %v1772_v25  ;;  %v2533_v27 = vpop.f32.mrb[78].mxu0 }
 0x4a0   : > { %v1787_v28 = vadd.f32 %v2533_v27, %v3248_v30  ;;  %v1781_v29 = vpop.f32.mrb[79].mxu0 }
 0x4a1   : > { %v1782_v62 = vadd.f32 %v3248_v30, %v1781_v29 }
 0x4a2   : > { %1821 = vst [vmem:[%s3255_s20 + $0xf8] sm:$0xff] %v1787_v28 }
 0x4a3   : > { %1820 = vst [vmem:[%s3255_s20 + $0xf0] sm:$0xff] %v1782_v62 }
 0x4a4 PF: > { %s21_s17 = sadd.s32 1, %s2724_s17  }
 0x4a5   : > { %p18_p4 = scmp.ge.s32.totalorder %s21_s17, 4  }
 0x4a7   :  { %20 = sbr.rel (!%p18_p4) target bundleno = 1 (0x1), region = 94 }

</bundles_post_ra>
